<compile_context>
chip_gen: v7x
topology: tpu7x:2x2x1
jax: 0.10.0
libtpu: 0.0.40
codegen_flags: <defaults>
</compile_context>

<pallas_src>
import functools

import jax
import jax.numpy as jnp
from jax.experimental import pallas as pl
from jax.experimental.pallas import tpu as pltpu

NL = 2      # input feature dim
NZ = 64     # hidden width
BN_EPS = 1e-5


def _bn_relu(h, gamma, beta, inv_b):
    """One-pass BatchNorm1d (batch stats over the lane/batch axis) + ReLU.

    h:     (NZ, B)   activations (features on sublanes, batch on lanes), f32
    gamma: (NZ, 1)   BN weight
    beta:  (NZ, 1)   BN bias
    """
    # Stats stay in f32; one-pass E[h^2] - mu^2 with a clamp on the rare
    # negative round-off (|mean|/std is O(1) for these layers, so no
    # catastrophic cancellation in practice).
    # TODO(synk): if the VALU slot still binds after the bias removal + bf16
    #   MXU change (check vmul/vadd counts in the bundle dump), move these two
    #   lane reductions onto the idle MXU via jnp.dot(h, ones((B, 1))).
    s = jnp.sum(h, axis=1, keepdims=True)            # (NZ, 1) lane reduce
    sq = jnp.sum(h * h, axis=1, keepdims=True)       # (NZ, 1)
    mu = s * inv_b
    var = jnp.maximum(sq * inv_b - mu * mu, 0.0)     # biased variance, one pass
    scale = gamma * jax.lax.rsqrt(var + BN_EPS)      # fold affine into scale/shift
    shift = beta - mu * scale
    return jnp.maximum(h * scale + shift, 0.0)       # 1 FMA + max per element


def l2e_kernel(x_ref,
               w1_ref, g1_ref, t1_ref,
               w2_ref, g2_ref, t2_ref,
               w3_ref, g3_ref, t3_ref,
               w4_ref, g4_ref, t4_ref,
               w5_ref, b5_ref,
               o_ref, *, transpose_out):
    nl = x_ref.shape[0]
    batch = x_ref.shape[1]
    inv_b = 1.0 / batch                               # static python float

    x = x_ref[...].astype(jnp.float32) + 1e-8         # (NL, B); y.view(-1,nl)+1e-8

    # ---- Layer 1: K = nl = 2 -> keep off the MXU, broadcast-FMAs on the VPU.
    # Linear bias omitted: BatchNorm subtracts the batch mean right after, so a
    # per-feature constant cancels exactly.
    w1 = w1_ref[...]                                  # (NZ, NL), f32
    h = w1[:, 0:1] * x[0:1, :]                        # (NZ,1)*(1,B) -> (NZ,B)
    for i in range(1, nl):                            # static, tiny unroll
        h = h + w1[:, i:i + 1] * x[i:i + 1, :]
    x = _bn_relu(h, g1_ref[...], t1_ref[...], inv_b)

    # ---- Layers 2-4: (NZ,NZ)@(NZ,B) on the MXU (bf16 operands, f32 accumulate)
    # then fused BN+ReLU.  Linear biases omitted (cancelled by BN).
    for w_ref, g_ref, t_ref in ((w2_ref, g2_ref, t2_ref),
                                (w3_ref, g3_ref, t3_ref),
                                (w4_ref, g4_ref, t4_ref)):
        w = w_ref[...]
        h = jnp.dot(w, x.astype(w.dtype), preferred_element_type=jnp.float32)
        x = _bn_relu(h, g_ref[...], t_ref[...], inv_b)

    # ---- Layer 5: plain Linear (bias kept -- no BN after it).
    w5 = w5_ref[...]
    out = jnp.dot(w5, x.astype(w5.dtype),
                  preferred_element_type=jnp.float32) + b5_ref[...]

    if transpose_out:
        # Batch is a 128-multiple: write (B, NZ) directly so the wrapper needs
        # no extra XLA transpose (a second HBM read+write of the whole result).
        o_ref[...] = out.T.astype(o_ref.dtype)
    else:
        o_ref[...] = out.astype(o_ref.dtype)          # lane-dense (NZ, B) store


def init_params(key, nl=NL, nz=NZ):
    """Deterministic synthetic params; PyTorch layouts: W is (out, in), vectors (out, 1)."""
    dims = [(nl, nz), (nz, nz), (nz, nz), (nz, nz), (nz, nz)]
    params = []
    for i, (din, dout) in enumerate(dims):
        kw, kb, key = jax.random.split(key, 3)
        bound = 1.0 / float(din) ** 0.5
        w = jax.random.uniform(kw, (dout, din), jnp.float32, -bound, bound)
        b = jax.random.uniform(kb, (dout, 1), jnp.float32, -bound, bound)
        params += [w, b]
        if i < 4:  # BatchNorm affine (PyTorch default: gamma=1, beta=0)
            params += [jnp.ones((dout, 1), jnp.float32),
                       jnp.zeros((dout, 1), jnp.float32)]
    return params


def l2e_forward(y, params, nl=NL, nz=NZ, use_bf16=True):
    (w1, b1, g1, t1, w2, b2, g2, t2, w3, b3, g3, t3,
     w4, b4, g4, t4, w5, b5) = params
    del b1, b2, b3, b4                          # cancelled exactly by BatchNorm

    y2d = y.reshape(-1, nl)                     # y.view(-1, nl)
    batch = y2d.shape[0]
    x_t = y2d.T                                 # (nl, B): ~8 bytes/row, negligible

    # bf16 MXU operands (f32 accumulation).  In a real model these casts should
    # be prepared once at parameter-load time, not per forward call.
    mm_dtype = jnp.bfloat16 if use_bf16 else jnp.float32
    kernel_args = (x_t,
                   w1, g1, t1,
                   w2.astype(mm_dtype), g2, t2,
                   w3.astype(mm_dtype), g3, t3,
                   w4.astype(mm_dtype), g4, t4,
                   w5.astype(mm_dtype), b5)

    # Only emit the in-kernel (B, NZ) output when the batch keeps tiles aligned;
    # other batch sizes fall back to the lane-dense (NZ, B) output + wrapper .T.
    transpose_out = (batch % 128 == 0)
    out_shape = (batch, nz) if transpose_out else (nz, batch)

    # VMEM budget sized to the actual buffers (with headroom), capped at 75% of
    # the physical per-core VMEM (64 MiB/TC on v7x vs 128 MiB on v5e/v6e).
    lanes = max(((batch + 127) // 128) * 128, 128)
    act_bytes = nz * lanes * 4
    est = nl * lanes * 4 + 8 * act_bytes + 5 * nz * nz * 4 + (1 << 20)
    try:
        vmem_cap = int(pltpu.get_tpu_info().vmem_capacity_bytes)
    except Exception:  # conservative fallback (v7x-sized)
        vmem_cap = 64 << 20
    vmem_limit = int(min(max(2 * est, 8 << 20), (vmem_cap * 3) // 4))

    flops = 2 * batch * (nl * nz + 4 * nz * nz) + 12 * batch * nz
    bytes_accessed = int(batch * nz * 4 +
                         sum(int(a.size) * a.dtype.itemsize for a in kernel_args))

    vmem = pl.BlockSpec(memory_space=pltpu.MemorySpace.VMEM)
    out = pl.pallas_call(
        functools.partial(l2e_kernel, transpose_out=transpose_out),
        out_shape=jax.ShapeDtypeStruct(out_shape, jnp.float32),
        in_specs=[vmem] * len(kernel_args),
        out_specs=vmem,
        compiler_params=pltpu.CompilerParams(vmem_limit_bytes=vmem_limit),
        cost_estimate=pl.CostEstimate(flops=flops,
                                      transcendentals=4 * nz,
                                      bytes_accessed=bytes_accessed),
    )(*kernel_args)
    return out if transpose_out else out.T      # already (B, nz) on the fast path


def l2e_reference(y, params, nl=NL):
    """Pure-JAX reference (training-mode BatchNorm, biased variance)."""
    x = y.reshape(-1, nl) + 1e-8
    (w1, b1, g1, t1, w2, b2, g2, t2, w3, b3, g3, t3,
     w4, b4, g4, t4, w5, b5) = params
    for w, b, g, t in [(w1, b1, g1, t1), (w2, b2, g2, t2),
                       (w3, b3, g3, t3), (w4, b4, g4, t4)]:
        h = x @ w.T + b.T
        mu = h.mean(axis=0, keepdims=True)
        var = ((h - mu) ** 2).mean(axis=0, keepdims=True)
        x = jnp.maximum((h - mu) / jnp.sqrt(var + BN_EPS) * g.T + t.T, 0.0)
    return x @ w5.T + b5.T


if __name__ == "__main__":
    key = jax.random.PRNGKey(0)
    k_small, k_big, k_par = jax.random.split(key, 3)
    params = init_params(k_par)

    # (a) Small, non-128-multiple batch: y.view(-1, nl) -> (8, 2).  Exercises
    #     the lane-dense fallback output path with exact f32 matmuls.
    y_small = jax.random.normal(k_small, (4, 2, NL), jnp.float32)
    out_small = jax.block_until_ready(l2e_forward(y_small, params, use_bf16=False))
    ref_small = l2e_reference(y_small, params)
    assert out_small.shape == (8, NZ)
    # One-pass variance / rsqrt vs the reference's two-pass 1/sqrt: tiny f32
    # differences only; real bugs give O(1) errors.
    assert jnp.allclose(out_small, ref_small, atol=2e-3, rtol=2e-3), \
        "f32 kernel mismatch vs reference"

    # (b) 128-multiple batch: exercises the bf16 MXU fast path and the
    #     in-kernel (B, NZ) output (no wrapper-side transpose round trip).
    y_big = jax.random.normal(k_big, (128, NL), jnp.float32)
    out_big = jax.block_until_ready(l2e_forward(y_big, params, use_bf16=True))
    ref_big = l2e_reference(y_big, params)
    assert out_big.shape == (128, NZ)
    err = float(jnp.max(jnp.abs(out_big - ref_big)))
    # bf16 MXU operands with f32 accumulation through 4 BN layers: small error.
    assert err < 0.1, f"bf16 kernel error too large: {err}"

    print("KERNEL_OK")
</pallas_src>

<mosaic_0001>
module attributes {stable_mosaic.version = 11 : i64} {
  func.func @l2e_kernel(%arg0: memref<2x8xf32, #tpu.memory_space<vmem>>, %arg1: memref<64x2xf32, #tpu.memory_space<vmem>>, %arg2: memref<64x1xf32, #tpu.memory_space<vmem>>, %arg3: memref<64x1xf32, #tpu.memory_space<vmem>>, %arg4: memref<64x64xf32, #tpu.memory_space<vmem>>, %arg5: memref<64x1xf32, #tpu.memory_space<vmem>>, %arg6: memref<64x1xf32, #tpu.memory_space<vmem>>, %arg7: memref<64x64xf32, #tpu.memory_space<vmem>>, %arg8: memref<64x1xf32, #tpu.memory_space<vmem>>, %arg9: memref<64x1xf32, #tpu.memory_space<vmem>>, %arg10: memref<64x64xf32, #tpu.memory_space<vmem>>, %arg11: memref<64x1xf32, #tpu.memory_space<vmem>>, %arg12: memref<64x1xf32, #tpu.memory_space<vmem>>, %arg13: memref<64x64xf32, #tpu.memory_space<vmem>>, %arg14: memref<64x1xf32, #tpu.memory_space<vmem>>, %arg15: memref<64x8xf32, #tpu.memory_space<vmem>>) attributes {dimension_semantics = [], scalar_prefetch = 0 : i64, scratch_operands = 0 : i64, tpu.core_type = #tpu.core_type<tc>} {
    %c0 = arith.constant 0 : index
    %c0_0 = arith.constant 0 : index
    %0 = vector.load %arg0[%c0, %c0_0] : memref<2x8xf32, #tpu.memory_space<vmem>>, vector<2x8xf32>
    %cst = arith.constant 9.99999993E-9 : f32
    %1 = vector.broadcast %cst : f32 to vector<2x8xf32>
    %2 = arith.addf %0, %1 : vector<2x8xf32>
    %c0_1 = arith.constant 0 : index
    %c0_2 = arith.constant 0 : index
    %3 = vector.load %arg1[%c0_1, %c0_2] : memref<64x2xf32, #tpu.memory_space<vmem>>, vector<64x2xf32>
    %4 = vector.extract_strided_slice %3 {offsets = [0, 0], sizes = [64, 1], strides = [1, 1]} : vector<64x2xf32> to vector<64x1xf32>
    %5 = vector.extract_strided_slice %2 {offsets = [0, 0], sizes = [1, 8], strides = [1, 1]} : vector<2x8xf32> to vector<1x8xf32>
    %6 = vector.broadcast %4 : vector<64x1xf32> to vector<64x8xf32>
    %7 = vector.broadcast %5 : vector<1x8xf32> to vector<64x8xf32>
    %8 = arith.mulf %6, %7 : vector<64x8xf32>
    %9 = vector.extract_strided_slice %3 {offsets = [0, 1], sizes = [64, 1], strides = [1, 1]} : vector<64x2xf32> to vector<64x1xf32>
    %10 = vector.extract_strided_slice %2 {offsets = [1, 0], sizes = [1, 8], strides = [1, 1]} : vector<2x8xf32> to vector<1x8xf32>
    %11 = vector.broadcast %9 : vector<64x1xf32> to vector<64x8xf32>
    %12 = vector.broadcast %10 : vector<1x8xf32> to vector<64x8xf32>
    %13 = arith.mulf %11, %12 : vector<64x8xf32>
    %14 = arith.addf %8, %13 : vector<64x8xf32>
    %c0_3 = arith.constant 0 : index
    %c0_4 = arith.constant 0 : index
    %15 = vector.load %arg2[%c0_3, %c0_4] : memref<64x1xf32, #tpu.memory_space<vmem>>, vector<64x1xf32>
    %c0_5 = arith.constant 0 : index
    %c0_6 = arith.constant 0 : index
    %16 = vector.load %arg3[%c0_5, %c0_6] : memref<64x1xf32, #tpu.memory_space<vmem>>, vector<64x1xf32>
    %cst_7 = arith.constant dense<0.000000e+00> : vector<64xf32>
    %17 = vector.multi_reduction <add>, %14, %cst_7 [1] : vector<64x8xf32> to vector<64xf32>
    %18 = vector.shape_cast %17 : vector<64xf32> to vector<64x1xf32>
    %19 = arith.mulf %14, %14 : vector<64x8xf32>
    %cst_8 = arith.constant dense<0.000000e+00> : vector<64xf32>
    %20 = vector.multi_reduction <add>, %19, %cst_8 [1] : vector<64x8xf32> to vector<64xf32>
    %21 = vector.shape_cast %20 : vector<64xf32> to vector<64x1xf32>
    %cst_9 = arith.constant 1.250000e-01 : f32
    %22 = vector.broadcast %cst_9 : f32 to vector<64x1xf32>
    %23 = arith.mulf %18, %22 : vector<64x1xf32>
    %cst_10 = arith.constant 1.250000e-01 : f32
    %24 = vector.broadcast %cst_10 : f32 to vector<64x1xf32>
    %25 = arith.mulf %21, %24 : vector<64x1xf32>
    %26 = arith.mulf %23, %23 : vector<64x1xf32>
    %27 = arith.subf %25, %26 : vector<64x1xf32>
    %cst_11 = arith.constant 0.000000e+00 : f32
    %28 = vector.broadcast %cst_11 : f32 to vector<64x1xf32>
    %29 = arith.maximumf %27, %28 : vector<64x1xf32>
    %cst_12 = arith.constant 9.99999974E-6 : f32
    %30 = vector.broadcast %cst_12 : f32 to vector<64x1xf32>
    %31 = arith.addf %29, %30 : vector<64x1xf32>
    %32 = math.rsqrt %31 : vector<64x1xf32>
    %33 = arith.mulf %15, %32 : vector<64x1xf32>
    %34 = arith.mulf %23, %33 : vector<64x1xf32>
    %35 = arith.subf %16, %34 : vector<64x1xf32>
    %36 = vector.broadcast %33 : vector<64x1xf32> to vector<64x8xf32>
    %37 = arith.mulf %14, %36 : vector<64x8xf32>
    %38 = vector.broadcast %35 : vector<64x1xf32> to vector<64x8xf32>
    %39 = arith.addf %37, %38 : vector<64x8xf32>
    %cst_13 = arith.constant 0.000000e+00 : f32
    %40 = vector.broadcast %cst_13 : f32 to vector<64x8xf32>
    %41 = arith.maximumf %39, %40 : vector<64x8xf32>
    %c0_14 = arith.constant 0 : index
    %c0_15 = arith.constant 0 : index
    %42 = vector.load %arg4[%c0_14, %c0_15] : memref<64x64xf32, #tpu.memory_space<vmem>>, vector<64x64xf32>
    %cst_16 = arith.constant dense<0.000000e+00> : vector<64x8xf32>
    %43 = tpu.matmul %42, %41, %cst_16 {dimension_numbers = #tpu.dot_dimension_numbers<[1], [0], [0], [1], [0, 0, 1, 1], [], []>} : vector<64x64xf32>, vector<64x8xf32>, vector<64x8xf32> -> vector<64x8xf32>
    %c0_17 = arith.constant 0 : index
    %c0_18 = arith.constant 0 : index
    %44 = vector.load %arg5[%c0_17, %c0_18] : memref<64x1xf32, #tpu.memory_space<vmem>>, vector<64x1xf32>
    %c0_19 = arith.constant 0 : index
    %c0_20 = arith.constant 0 : index
    %45 = vector.load %arg6[%c0_19, %c0_20] : memref<64x1xf32, #tpu.memory_space<vmem>>, vector<64x1xf32>
    %cst_21 = arith.constant dense<0.000000e+00> : vector<64xf32>
    %46 = vector.multi_reduction <add>, %43, %cst_21 [1] : vector<64x8xf32> to vector<64xf32>
    %47 = vector.shape_cast %46 : vector<64xf32> to vector<64x1xf32>
    %48 = arith.mulf %43, %43 : vector<64x8xf32>
    %cst_22 = arith.constant dense<0.000000e+00> : vector<64xf32>
    %49 = vector.multi_reduction <add>, %48, %cst_22 [1] : vector<64x8xf32> to vector<64xf32>
    %50 = vector.shape_cast %49 : vector<64xf32> to vector<64x1xf32>
    %cst_23 = arith.constant 1.250000e-01 : f32
    %51 = vector.broadcast %cst_23 : f32 to vector<64x1xf32>
    %52 = arith.mulf %47, %51 : vector<64x1xf32>
    %cst_24 = arith.constant 1.250000e-01 : f32
    %53 = vector.broadcast %cst_24 : f32 to vector<64x1xf32>
    %54 = arith.mulf %50, %53 : vector<64x1xf32>
    %55 = arith.mulf %52, %52 : vector<64x1xf32>
    %56 = arith.subf %54, %55 : vector<64x1xf32>
    %cst_25 = arith.constant 0.000000e+00 : f32
    %57 = vector.broadcast %cst_25 : f32 to vector<64x1xf32>
    %58 = arith.maximumf %56, %57 : vector<64x1xf32>
    %cst_26 = arith.constant 9.99999974E-6 : f32
    %59 = vector.broadcast %cst_26 : f32 to vector<64x1xf32>
    %60 = arith.addf %58, %59 : vector<64x1xf32>
    %61 = math.rsqrt %60 : vector<64x1xf32>
    %62 = arith.mulf %44, %61 : vector<64x1xf32>
    %63 = arith.mulf %52, %62 : vector<64x1xf32>
    %64 = arith.subf %45, %63 : vector<64x1xf32>
    %65 = vector.broadcast %62 : vector<64x1xf32> to vector<64x8xf32>
    %66 = arith.mulf %43, %65 : vector<64x8xf32>
    %67 = vector.broadcast %64 : vector<64x1xf32> to vector<64x8xf32>
    %68 = arith.addf %66, %67 : vector<64x8xf32>
    %cst_27 = arith.constant 0.000000e+00 : f32
    %69 = vector.broadcast %cst_27 : f32 to vector<64x8xf32>
    %70 = arith.maximumf %68, %69 : vector<64x8xf32>
    %c0_28 = arith.constant 0 : index
    %c0_29 = arith.constant 0 : index
    %71 = vector.load %arg7[%c0_28, %c0_29] : memref<64x64xf32, #tpu.memory_space<vmem>>, vector<64x64xf32>
    %cst_30 = arith.constant dense<0.000000e+00> : vector<64x8xf32>
    %72 = tpu.matmul %71, %70, %cst_30 {dimension_numbers = #tpu.dot_dimension_numbers<[1], [0], [0], [1], [0, 0, 1, 1], [], []>} : vector<64x64xf32>, vector<64x8xf32>, vector<64x8xf32> -> vector<64x8xf32>
    %c0_31 = arith.constant 0 : index
    %c0_32 = arith.constant 0 : index
    %73 = vector.load %arg8[%c0_31, %c0_32] : memref<64x1xf32, #tpu.memory_space<vmem>>, vector<64x1xf32>
    %c0_33 = arith.constant 0 : index
    %c0_34 = arith.constant 0 : index
    %74 = vector.load %arg9[%c0_33, %c0_34] : memref<64x1xf32, #tpu.memory_space<vmem>>, vector<64x1xf32>
    %cst_35 = arith.constant dense<0.000000e+00> : vector<64xf32>
    %75 = vector.multi_reduction <add>, %72, %cst_35 [1] : vector<64x8xf32> to vector<64xf32>
    %76 = vector.shape_cast %75 : vector<64xf32> to vector<64x1xf32>
    %77 = arith.mulf %72, %72 : vector<64x8xf32>
    %cst_36 = arith.constant dense<0.000000e+00> : vector<64xf32>
    %78 = vector.multi_reduction <add>, %77, %cst_36 [1] : vector<64x8xf32> to vector<64xf32>
    %79 = vector.shape_cast %78 : vector<64xf32> to vector<64x1xf32>
    %cst_37 = arith.constant 1.250000e-01 : f32
    %80 = vector.broadcast %cst_37 : f32 to vector<64x1xf32>
    %81 = arith.mulf %76, %80 : vector<64x1xf32>
    %cst_38 = arith.constant 1.250000e-01 : f32
    %82 = vector.broadcast %cst_38 : f32 to vector<64x1xf32>
    %83 = arith.mulf %79, %82 : vector<64x1xf32>
    %84 = arith.mulf %81, %81 : vector<64x1xf32>
    %85 = arith.subf %83, %84 : vector<64x1xf32>
    %cst_39 = arith.constant 0.000000e+00 : f32
    %86 = vector.broadcast %cst_39 : f32 to vector<64x1xf32>
    %87 = arith.maximumf %85, %86 : vector<64x1xf32>
    %cst_40 = arith.constant 9.99999974E-6 : f32
    %88 = vector.broadcast %cst_40 : f32 to vector<64x1xf32>
    %89 = arith.addf %87, %88 : vector<64x1xf32>
    %90 = math.rsqrt %89 : vector<64x1xf32>
    %91 = arith.mulf %73, %90 : vector<64x1xf32>
    %92 = arith.mulf %81, %91 : vector<64x1xf32>
    %93 = arith.subf %74, %92 : vector<64x1xf32>
    %94 = vector.broadcast %91 : vector<64x1xf32> to vector<64x8xf32>
    %95 = arith.mulf %72, %94 : vector<64x8xf32>
    %96 = vector.broadcast %93 : vector<64x1xf32> to vector<64x8xf32>
    %97 = arith.addf %95, %96 : vector<64x8xf32>
    %cst_41 = arith.constant 0.000000e+00 : f32
    %98 = vector.broadcast %cst_41 : f32 to vector<64x8xf32>
    %99 = arith.maximumf %97, %98 : vector<64x8xf32>
    %c0_42 = arith.constant 0 : index
    %c0_43 = arith.constant 0 : index
    %100 = vector.load %arg10[%c0_42, %c0_43] : memref<64x64xf32, #tpu.memory_space<vmem>>, vector<64x64xf32>
    %cst_44 = arith.constant dense<0.000000e+00> : vector<64x8xf32>
    %101 = tpu.matmul %100, %99, %cst_44 {dimension_numbers = #tpu.dot_dimension_numbers<[1], [0], [0], [1], [0, 0, 1, 1], [], []>} : vector<64x64xf32>, vector<64x8xf32>, vector<64x8xf32> -> vector<64x8xf32>
    %c0_45 = arith.constant 0 : index
    %c0_46 = arith.constant 0 : index
    %102 = vector.load %arg11[%c0_45, %c0_46] : memref<64x1xf32, #tpu.memory_space<vmem>>, vector<64x1xf32>
    %c0_47 = arith.constant 0 : index
    %c0_48 = arith.constant 0 : index
    %103 = vector.load %arg12[%c0_47, %c0_48] : memref<64x1xf32, #tpu.memory_space<vmem>>, vector<64x1xf32>
    %cst_49 = arith.constant dense<0.000000e+00> : vector<64xf32>
    %104 = vector.multi_reduction <add>, %101, %cst_49 [1] : vector<64x8xf32> to vector<64xf32>
    %105 = vector.shape_cast %104 : vector<64xf32> to vector<64x1xf32>
    %106 = arith.mulf %101, %101 : vector<64x8xf32>
    %cst_50 = arith.constant dense<0.000000e+00> : vector<64xf32>
    %107 = vector.multi_reduction <add>, %106, %cst_50 [1] : vector<64x8xf32> to vector<64xf32>
    %108 = vector.shape_cast %107 : vector<64xf32> to vector<64x1xf32>
    %cst_51 = arith.constant 1.250000e-01 : f32
    %109 = vector.broadcast %cst_51 : f32 to vector<64x1xf32>
    %110 = arith.mulf %105, %109 : vector<64x1xf32>
    %cst_52 = arith.constant 1.250000e-01 : f32
    %111 = vector.broadcast %cst_52 : f32 to vector<64x1xf32>
    %112 = arith.mulf %108, %111 : vector<64x1xf32>
    %113 = arith.mulf %110, %110 : vector<64x1xf32>
    %114 = arith.subf %112, %113 : vector<64x1xf32>
    %cst_53 = arith.constant 0.000000e+00 : f32
    %115 = vector.broadcast %cst_53 : f32 to vector<64x1xf32>
    %116 = arith.maximumf %114, %115 : vector<64x1xf32>
    %cst_54 = arith.constant 9.99999974E-6 : f32
    %117 = vector.broadcast %cst_54 : f32 to vector<64x1xf32>
    %118 = arith.addf %116, %117 : vector<64x1xf32>
    %119 = math.rsqrt %118 : vector<64x1xf32>
    %120 = arith.mulf %102, %119 : vector<64x1xf32>
    %121 = arith.mulf %110, %120 : vector<64x1xf32>
    %122 = arith.subf %103, %121 : vector<64x1xf32>
    %123 = vector.broadcast %120 : vector<64x1xf32> to vector<64x8xf32>
    %124 = arith.mulf %101, %123 : vector<64x8xf32>
    %125 = vector.broadcast %122 : vector<64x1xf32> to vector<64x8xf32>
    %126 = arith.addf %124, %125 : vector<64x8xf32>
    %cst_55 = arith.constant 0.000000e+00 : f32
    %127 = vector.broadcast %cst_55 : f32 to vector<64x8xf32>
    %128 = arith.maximumf %126, %127 : vector<64x8xf32>
    %c0_56 = arith.constant 0 : index
    %c0_57 = arith.constant 0 : index
    %129 = vector.load %arg13[%c0_56, %c0_57] : memref<64x64xf32, #tpu.memory_space<vmem>>, vector<64x64xf32>
    %cst_58 = arith.constant dense<0.000000e+00> : vector<64x8xf32>
    %130 = tpu.matmul %129, %128, %cst_58 {dimension_numbers = #tpu.dot_dimension_numbers<[1], [0], [0], [1], [0, 0, 1, 1], [], []>} : vector<64x64xf32>, vector<64x8xf32>, vector<64x8xf32> -> vector<64x8xf32>
    %c0_59 = arith.constant 0 : index
    %c0_60 = arith.constant 0 : index
    %131 = vector.load %arg14[%c0_59, %c0_60] : memref<64x1xf32, #tpu.memory_space<vmem>>, vector<64x1xf32>
    %132 = vector.broadcast %131 : vector<64x1xf32> to vector<64x8xf32>
    %133 = arith.addf %130, %132 : vector<64x8xf32>
    %c0_61 = arith.constant 0 : index
    %c0_62 = arith.constant 0 : index
    %134 = vector.load %arg15[%c0_61, %c0_62] : memref<64x8xf32, #tpu.memory_space<vmem>>, vector<64x8xf32>
    tpu.vector_store %arg15[%c0_61, %c0_62], %133 {strides = array<i32>} : memref<64x8xf32, #tpu.memory_space<vmem>>, vector<64x8xf32>,
    return
  }
}

</mosaic_0001>

<bundles_post_ra>
// kernel: tpu_custom_call.1
= control target key start
LH: loop header
LB: loop body
LE: loop exit
PB: predicated region body
PF: predicated region fallthrough
CT: control target
= control target key end

     0   :  { %v2148_v0 = vmov 1   ;;  %v2149_v4 = vmov 0   ;;  %v100_v10 = vlaneseq  ;;  %vm180_vm0 = vcmask 64512   ;;  %s3029_s1 = inlined_call_operand.vmem [shape: f32[64,2], index: 1, kind: input, shape index: {}]   ;;  %s3030_s0 = inlined_call_operand.vmem [shape: f32[2,8], index: 0, kind: input, shape index: {}]   ;;  %s3031_s2 = inlined_call_operand.vmem [shape: f32[64,1], index: 2, kind: input, shape index: {}]   ;;  %s3032_s3 = inlined_call_operand.vmem [shape: f32[64,1], index: 3, kind: input, shape index: {}]   ;;  %s3033_s4 = inlined_call_operand.vmem [shape: f32[64,64], index: 4, kind: input, shape index: {}]   ;;  %s3034_s5 = inlined_call_operand.vmem [shape: f32[64,1], index: 5, kind: input, shape index: {}]   ;;  %s3035_s6 = inlined_call_operand.vmem [shape: f32[64,1], index: 6, kind: input, shape index: {}]   ;;  %s3036_s7 = inlined_call_operand.vmem [shape: f32[64,64], index: 7, kind: input, shape index: {}]   ;;  %s3037_s8 = inlined_call_operand.vmem [shape: f32[64,1], index: 8, kind: input, shape index: {}]   ;;  %s3038_s9 = inlined_call_operand.vmem [shape: f32[64,1], index: 9, kind: input, shape index: {}]   ;;  %s3039_s10 = inlined_call_operand.vmem [shape: f32[64,64], index: 10, kind: input, shape index: {}]   ;;  %s3040_s11 = inlined_call_operand.vmem [shape: f32[64,1], index: 11, kind: input, shape index: {}]   ;;  %s3041_s12 = inlined_call_operand.vmem [shape: f32[64,1], index: 12, kind: input, shape index: {}]   ;;  %s3042_s14 = inlined_call_operand.vmem [shape: f32[64,1], index: 14, kind: input, shape index: {}]   ;;  %s3043_s13 = inlined_call_operand.vmem [shape: f32[64,64], index: 13, kind: input, shape index: {}]   ;;  %s3044_s15 = inlined_call_operand.vmem [shape: f32[64,8], index: 15, kind: output, shape index: {}]  }
   0x1   :  { %2074 = vset.pattern.permute.xlu0 %v2148_v0  ;;  %2072 = vset.pattern.permute.xlu1 %v2148_v0  ;;  %v54_v1 = vld [vmem:[%s3029_s1 + $0x10] sm:$0xff]  ;;  %v52_v2 = vld [vmem:[%s3029_s1] sm:$0xff]  ;;  %v53_v3 = vld [vmem:[%s3029_s1 + $0x8] sm:$0xff]  ;;  %vm429_vm1 = vcmask 523264  }
   0x2   :  { %121 = vperm.xlu0 %2074, %v54_v1   ;;  %113 = vperm.xlu1 %2072, %v52_v2   ;;  %v55_v5 = vld [vmem:[%s3029_s1 + $0x18] sm:$0xff]  ;;  %v57_v6 = vld [vmem:[%s3029_s1 + $0x28] sm:$0xff]  ;;  %v56_v7 = vld [vmem:[%s3029_s1 + $0x20] sm:$0xff]  ;;  %v101_v11 = vshrl.u32 %v100_v10, 7 }
   0x3   :  { %v58_v8 = vld [vmem:[%s3029_s1 + $0x30] sm:$0xff]  ;;  %v59_v9 = vld [vmem:[%s3029_s1 + $0x38] sm:$0xff]  ;;  %v50_v12 = vld [vmem:[%s3030_s0] sm:$0x3] }
   0x4   :  { %v146_v13 = vsub.s32 1, %v101_v11  ;;  %v51_v14 = vadd.f32 1e-08, %v50_v12  ;;  %v102_v15 = vsub.s32 0, %v101_v11 }
   0x6   :  { %2075 = vset.pattern.permute.xlu0 %v2149_v4  ;;  %117 = vperm.xlu1 %2072, %v53_v3   ;;  %v147_v18 = vrot.slane %v51_v14, %v146_v13  ;;  %v103_v19 = vrot.slane %v51_v14, %v102_v15 }
   0x7   :  { %62 = vperm.xlu0 %2075, %v52_v2  }
   0xa   :  { %2073 = vset.pattern.permute.xlu1 %v2149_v4 }
   0xb   :  { %67 = vperm.xlu0 %2075, %v53_v3   ;;  %77 = vperm.xlu1 %2073, %v55_v5  }
   0xf   :  { %72 = vperm.xlu0 %2075, %v54_v1   ;;  %2076 = vset.pattern.permute.xlu1 %v2148_v0 }
  0x10   :  { %125 = vperm.xlu1 %2076, %v55_v5  }
  0x13   :  { %87 = vperm.xlu0 %2075, %v57_v6  }
  0x14   :  { %2077 = vset.pattern.permute.xlu1 %v2149_v4 }
  0x15   :  { %82 = vperm.xlu1 %2077, %v56_v7  }
  0x17   :  { %92 = vperm.xlu0 %2075, %v58_v8  }
  0x19   :  { %2078 = vset.pattern.permute.xlu1 %v2148_v0 }
  0x1a   :  { %129 = vperm.xlu1 %2078, %v56_v7  }
  0x1b   :  { %2080 = vset.pattern.permute.xlu0 %v2148_v0 }
  0x1c   :  { %137 = vperm.xlu0 %2080, %v58_v8  }
  0x1e   :  { %133 = vperm.xlu1 %2078, %v57_v6  }
  0x20   :  { %2082 = vset.pattern.permute.xlu0 %v2149_v4 }
  0x22   :  { %2079 = vset.pattern.permute.xlu1 %v2149_v4 }
  0x23   :  { %97 = vperm.xlu1 %2079, %v59_v9  }
  0x27   :  { %2081 = vset.pattern.permute.xlu1 %v2148_v0 }
  0x28   :  { %141 = vperm.xlu1 %2081, %v59_v9  }
  0x2c   :  { %2083 = vset.pattern.permute.xlu1 %v2149_v4 }
  0x81   :  { %v114_v16 = vpop.permute.xlu1 %113  ;;  %v122_v17 = vpop.permute.xlu0 %121 }
  0x82   :  { %v148_v22 = vmul.f32 %v147_v18, %v114_v16  ;;  %v150_v30 = vmul.f32 %v147_v18, %v122_v17 }
  0x85   :  { %v118_v20 = vpop.permute.xlu1 %117 }
  0x86   :  { %v63_v21 = vpop.permute.xlu0 %62  ;;  %v149_v27 = vmul.f32 %v147_v18, %v118_v20 }
  0x87   :  { %v104_v23 = vmul.f32 %v103_v19, %v63_v21 }
  0x89   :  { %v2257_v24 = vadd.f32 %v148_v22, %v104_v23 }
  0x8a   :  { %v68_v25 = vpop.permute.xlu0 %67  ;;  %v78_v26 = vpop.permute.xlu1 %77 }
  0x8b   :  { %v105_v28 = vmul.f32 %v103_v19, %v68_v25  ;;  %v181_v29 = vsel %vm180_vm0, %v2257_v24, 0.0  ;;  %v107_v36 = vmul.f32 %v103_v19, %v78_v26  ;;  %v205_v61 = vmul.f32 %v2257_v24, %v2257_v24 }
  0x8c   :  { %182 = vadd.xlane.f32.xlu1 %v181_v29 }
  0x8d   :  { %v2261_v31 = vadd.f32 %v149_v27, %v105_v28  ;;  %v213_v62 = vsel %vm180_vm0, %v205_v61, 0.0 }
  0x8e   :  { %v73_v32 = vpop.permute.xlu0 %72 }
  0x8f   :  { %v106_v33 = vmul.f32 %v103_v19, %v73_v32  ;;  %v126_v34 = vpop.permute.xlu1 %125  ;;  %v184_v35 = vsel %vm180_vm0, %v2261_v31, 0.0  ;;  %v206_v7 = vmul.f32 %v2261_v31, %v2261_v31 }
  0x90   :  { %v151_v37 = vmul.f32 %v147_v18, %v126_v34  ;;  %185 = vadd.xlane.f32.xlu0 %v184_v35 }
  0x91   :  { %v2265_v38 = vadd.f32 %v150_v30, %v106_v33  ;;  %v216_v10 = vsel %vm180_vm0, %v206_v7, 0.0 }
  0x92   :  { %v2267_v39 = vadd.f32 %v151_v37, %v107_v36  ;;  %v88_v40 = vpop.permute.xlu0 %87 }
  0x93   :  { %v187_v41 = vsel %vm180_vm0, %v2265_v38, 0.0  ;;  %v109_v53 = vmul.f32 %v103_v19, %v88_v40  ;;  %v207_v63 = vmul.f32 %v2265_v38, %v2265_v38 }
  0x94   :  { %v83_v42 = vpop.permute.xlu1 %82  ;;  %188 = vadd.xlane.f32.xlu0 %v187_v41  ;;  %v190_v43 = vsel %vm180_vm0, %v2267_v39, 0.0  ;;  %v208_v11 = vmul.f32 %v2267_v39, %v2267_v39 }
  0x95   :  { %191 = vadd.xlane.f32.xlu1 %v190_v43  ;;  %v108_v46 = vmul.f32 %v103_v19, %v83_v42  ;;  %v219_v4 = vsel %vm180_vm0, %v207_v63, 0.0 }
  0x96   :  { %v93_v44 = vpop.permute.xlu0 %92  ;;  %v222_v13 = vsel %vm180_vm0, %v208_v11, 0.0 }
  0x97   :  { %v110_v49 = vmul.f32 %v103_v19, %v93_v44 }
  0x99   :  { %v130_v45 = vpop.permute.xlu1 %129 }
  0x9a   :  { %v152_v47 = vmul.f32 %v147_v18, %v130_v45 }
  0x9b   :  { %v138_v48 = vpop.permute.xlu0 %137 }
  0x9c   :  { %v2273_v50 = vadd.f32 %v152_v47, %v108_v46  ;;  %v154_v51 = vmul.f32 %v147_v18, %v138_v48 }
  0x9d   :  { %v134_v52 = vpop.permute.xlu1 %133 }
  0x9e   :  { %v2275_v54 = vadd.f32 %v154_v51, %v110_v49  ;;  %v153_v55 = vmul.f32 %v147_v18, %v134_v52  ;;  %v193_v56 = vsel %vm180_vm0, %v2273_v50, 0.0  ;;  %v209_v5 = vmul.f32 %v2273_v50, %v2273_v50 }
  0x9f   :  { %194 = vadd.xlane.f32.xlu0 %v193_v56 }
  0xa0   :  { %v2279_v57 = vadd.f32 %v153_v55, %v109_v53  ;;  %v199_v59 = vsel %vm180_vm0, %v2275_v54, 0.0  ;;  %v225_v8 = vsel %vm180_vm0, %v209_v5, 0.0  ;;  %v211_v9 = vmul.f32 %v2275_v54, %v2275_v54  ;;  %v164_v5 = vld [vmem:[%s3031_s2] sm:$0xff] }
  0xa2   :  { %v98_v58 = vpop.permute.xlu1 %97  ;;  %v196_v60 = vsel %vm180_vm0, %v2279_v57, 0.0  ;;  %v231_v12 = vsel %vm180_vm0, %v211_v9, 0.0  ;;  %v210_v14 = vmul.f32 %v2279_v57, %v2279_v57 }
  0xa3   :  { %200 = vadd.xlane.f32.xlu0 %v199_v59  ;;  %197 = vadd.xlane.f32.xlu1 %v196_v60  ;;  %v111_v1 = vmul.f32 %v103_v19, %v98_v58 }
  0xa4   :  { %v228_v15 = vsel %vm180_vm0, %v210_v14, 0.0 }
  0xa7   :  { %v142_v0 = vpop.permute.xlu1 %141  ;;  %214 = vadd.xlane.f32.xlu0 %v213_v62 }
  0xa8   :  { %v155_v2 = vmul.f32 %v147_v18, %v142_v0 }
  0xaa   :  { %v2290_v3 = vadd.f32 %v155_v2, %v111_v1 }
  0xab   :  { %220 = vadd.xlane.f32.xlu0 %v219_v4 }
  0xac   :  { %v202_v6 = vsel %vm180_vm0, %v2290_v3, 0.0  ;;  %v212_v16 = vmul.f32 %v2290_v3, %v2290_v3 }
  0xad   :  { %203 = vadd.xlane.f32.xlu1 %v202_v6 }
  0xae   :  { %v234_v17 = vsel %vm180_vm0, %v212_v16, 0.0 }
  0xaf   :  { %226 = vadd.xlane.f32.xlu0 %v225_v8 }
  0xb1   :  { %217 = vadd.xlane.f32.xlu1 %v216_v10 }
  0xb3   :  { %232 = vadd.xlane.f32.xlu0 %v231_v12 }
  0xb5   :  { %223 = vadd.xlane.f32.xlu1 %v222_v13 }
  0xb9   :  { %229 = vadd.xlane.f32.xlu1 %v228_v15 }
  0xbd   :  { %235 = vadd.xlane.f32.xlu1 %v234_v17 }
 0x119   :  { %v183_v21 = vpop.xlane.xlu1 %182 }
 0x11a   :  { %v2313_v23 = vmul.f32 0.125, %v183_v21 }
 0x11c   :  { %v253_v27 = vmul.f32 %v2313_v23, %v2313_v23 }
 0x11d   :  { %v186_v18 = vpop.xlane.xlu0 %185 }
 0x11e   :  { %v2319_v37 = vmul.f32 0.125, %v186_v18 }
 0x120   :  { %v254_v46 = vmul.f32 %v2319_v37, %v2319_v37 }
 0x121   :  { %v189_v19 = vpop.xlane.xlu0 %188 }
 0x122   :  { %v192_v25 = vpop.xlane.xlu1 %191  ;;  %v2317_v30 = vmul.f32 0.125, %v189_v19 }
 0x123   :  { %v2327_v47 = vmul.f32 0.125, %v192_v25 }
 0x124   :  { %v255_v40 = vmul.f32 %v2317_v30, %v2317_v30 }
 0x125   :  { %v256_v60 = vmul.f32 %v2327_v47, %v2327_v47 }
 0x12c   :  { %v195_v20 = vpop.xlane.xlu0 %194 }
 0x12d   :  { %v2323_v44 = vmul.f32 0.125, %v195_v20 }
 0x12f   :  { %v257_v53 = vmul.f32 %v2323_v44, %v2323_v44 }
 0x130   :  { %v201_v22 = vpop.xlane.xlu0 %200  ;;  %v198_v29 = vpop.xlane.xlu1 %197 }
 0x131   :  { %v2331_v55 = vmul.f32 0.125, %v201_v22  ;;  %v2333_v56 = vmul.f32 0.125, %v198_v29  ;;  %v165_v29 = vld [vmem:[%s3031_s2 + $0x8] sm:$0xff] }
 0x133   :  { %v259_v6 = vmul.f32 %v2331_v55, %v2331_v55  ;;  %v258_v7 = vmul.f32 %v2333_v56, %v2333_v56 }
 0x134   :  { %v215_v26 = vpop.xlane.xlu0 %214 }
 0x135   :  { %v245_v28 = vmul.f32 0.125, %v215_v26 }
 0x137   :  { %v261_v32 = vsub.f32 %v245_v28, %v253_v27 }
 0x138   :  { %v221_v33 = vpop.xlane.xlu0 %220 }
 0x139   :  { %v269_v34 = vmax.f32 %v261_v32, 0.0  ;;  %v247_v35 = vmul.f32 0.125, %v221_v33 }
 0x13a   :  { %v204_v36 = vpop.xlane.xlu1 %203 }
 0x13b   :  { %v277_v41 = vadd.f32 1e-05, %v269_v34  ;;  %v263_v43 = vsub.f32 %v247_v35, %v255_v40  ;;  %v244_v10 = vmul.f32 0.125, %v204_v36  ;;  %v166_v40 = vld [vmem:[%s3031_s2 + $0x10] sm:$0xff] }
 0x13c   :  { %v227_v42 = vpop.xlane.xlu0 %226 }
 0x13d   :  { %2084 = vrsqrt.f32 %v277_v41  ;;  %v249_v49 = vmul.f32 0.125, %v227_v42  ;;  %v271_v51 = vmax.f32 %v263_v43, 0.0  ;;  %v260_v19 = vmul.f32 %v244_v10, %v244_v10  ;;  %v167_v43 = vld [vmem:[%s3031_s2 + $0x18] sm:$0xff] }
 0x13e   :  { %v218_v45 = vpop.xlane.xlu1 %217 }
 0x13f   :  { %v246_v48 = vmul.f32 0.125, %v218_v45  ;;  %v265_v63 = vsub.f32 %v249_v49, %v257_v53  ;;  %v279_v0 = vadd.f32 1e-05, %v271_v51  ;;  %v169_v45 = vld [vmem:[%s3031_s2 + $0x28] sm:$0xff]  ;;  %v171_v53 = vld [vmem:[%s3031_s2 + $0x38] sm:$0xff] }
 0x140   :  { %v233_v58 = vpop.xlane.xlu0 %232 }
 0x141   :  { %v262_v52 = vsub.f32 %v246_v48, %v254_v46  ;;  %v251_v2 = vmul.f32 0.125, %v233_v58  ;;  %v273_v13 = vmax.f32 %v265_v63, 0.0  ;;  %v170_v63 = vld [vmem:[%s3031_s2 + $0x30] sm:$0xff] }
 0x142   :  { %v224_v59 = vpop.xlane.xlu1 %223 }
 0x143   :  { %v270_v61 = vmax.f32 %v262_v52, 0.0  ;;  %v248_v62 = vmul.f32 0.125, %v224_v59  ;;  %v267_v15 = vsub.f32 %v251_v2, %v259_v6  ;;  %v281_v22 = vadd.f32 1e-05, %v273_v13  ;;  %v168_v52 = vld [vmem:[%s3031_s2 + $0x20] sm:$0xff]  ;;  %v179_v6 = vld [vmem:[%s3032_s3 + $0x38] sm:$0xff] }
 0x145   :  { %v278_v1 = vadd.f32 1e-05, %v270_v61  ;;  %v264_v4 = vsub.f32 %v248_v62, %v256_v60  ;;  %v275_v25 = vmax.f32 %v267_v15, 0.0 }
 0x146   :  { %v230_v8 = vpop.xlane.xlu1 %229 }
 0x147   :  { %v2085_v9 = vpop.eup %2084  ;;  %2086 = vrsqrt.f32 %v278_v1  ;;  %v272_v11 = vmax.f32 %v264_v4, 0.0  ;;  %v250_v12 = vmul.f32 0.125, %v230_v8  ;;  %v283_v33 = vadd.f32 1e-05, %v275_v25 }
 0x148   :  { %v293_v14 = vmul.f32 %v2085_v9, %v164_v5  ;;  %2088 = vrsqrt.f32 %v279_v0  ;;  %v177_v0 = vld [vmem:[%s3032_s3 + $0x28] sm:$0xff] }
 0x149   :  { %v280_v16 = vadd.f32 1e-05, %v272_v11  ;;  %v266_v17 = vsub.f32 %v250_v12, %v258_v7  ;;  %v173_v11 = vld [vmem:[%s3032_s3 + $0x8] sm:$0xff]  ;;  %v174_v12 = vld [vmem:[%s3032_s3 + $0x10] sm:$0xff] }
 0x14a   :  { %319 = vperm.xlu0 %2082, %v293_v14   ;;  %v236_v18 = vpop.xlane.xlu1 %235  ;;  %v301_v4 = vmul.f32 %v293_v14, %v2313_v23 }
 0x14b   :  { %v274_v20 = vmax.f32 %v266_v17, 0.0  ;;  %v252_v21 = vmul.f32 0.125, %v236_v18  ;;  %2090 = vrsqrt.f32 %v280_v16 }
 0x14d   :  { %v282_v26 = vadd.f32 1e-05, %v274_v20  ;;  %v268_v27 = vsub.f32 %v252_v21, %v260_v19 }
 0x14f   :  { %2092 = vrsqrt.f32 %v282_v26  ;;  %v276_v28 = vmax.f32 %v268_v27, 0.0 }
 0x150   :  { %2094 = vrsqrt.f32 %v281_v22 }
 0x151   :  { %v2087_v32 = vpop.eup %2086  ;;  %v284_v34 = vadd.f32 1e-05, %v276_v28 }
 0x152   :  { %v294_v35 = vmul.f32 %v2087_v32, %v165_v29  ;;  %v2089_v36 = vpop.eup %2088 }
 0x153   :  { %2096 = vrsqrt.f32 %v284_v34  ;;  %v295_v41 = vmul.f32 %v2089_v36, %v166_v40 }
 0x154   :  { %324 = vperm.xlu1 %2083, %v294_v35   ;;  %2098 = vrsqrt.f32 %v283_v33  ;;  %v302_v9 = vmul.f32 %v294_v35, %v2319_v37  ;;  %v175_v37 = vld [vmem:[%s3032_s3 + $0x18] sm:$0xff] }
 0x155   :  { %v2091_v42 = vpop.eup %2090 }
 0x156   :  { %v296_v48 = vmul.f32 %v2091_v42, %v167_v43  ;;  %v310_v23 = vsub.f32 %v173_v11, %v302_v9  ;;  %v426_v9 = vld [vmem:[%s3033_s4 + $0x28] sm:$0xff]  ;;  %v427_v11 = vld [vmem:[%s3033_s4 + $0x30] sm:$0xff] }
 0x158   :  { %329 = vperm.xlu1 %2083, %v295_v41   ;;  %v304_v14 = vmul.f32 %v296_v48, %v2327_v47  ;;  %v178_v47 = vld [vmem:[%s3032_s3 + $0x30] sm:$0xff] }
 0x159   :  { %v2093_v46 = vpop.eup %2092 }
 0x15a   :  { %v298_v49 = vmul.f32 %v2093_v46, %v169_v45  ;;  %v2095_v51 = vpop.eup %2094  ;;  %v312_v15 = vsub.f32 %v175_v37, %v304_v14 }
 0x15b   :  { %v297_v59 = vmul.f32 %v2095_v51, %v168_v52 }
 0x15c   :  { %334 = vperm.xlu1 %2083, %v296_v48   ;;  %344 = vperm.xlu0 %2082, %v298_v49   ;;  %v306_v61 = vmul.f32 %v298_v49, %v2333_v56  ;;  %v172_v56 = vld [vmem:[%s3032_s3] sm:$0xff] }
 0x15d   :  { %v2097_v58 = vpop.eup %2096  ;;  %v309_v7 = vsub.f32 %v172_v56, %v301_v4  ;;  %v305_v16 = vmul.f32 %v297_v59, %v2323_v44  ;;  %v421_v44 = vld [vmem:[%s3033_s4] sm:$0xff] }
 0x15e   :  { %v300_v60 = vmul.f32 %v2097_v58, %v171_v53  ;;  %v2099_v62 = vpop.eup %2098  ;;  %v314_v2 = vsub.f32 %v177_v0, %v306_v61  ;;  %1910 = vmatprep.mubr.msk.f32.mxu0 %vm429_vm1, %v421_v44 }
 0x15f   :  { %v299_v1 = vmul.f32 %v2099_v62, %v170_v63 }
 0x160   :  { %339 = vperm.xlu1 %2083, %v297_v59   ;;  %354 = vperm.xlu0 %2082, %v300_v60   ;;  %v308_v5 = vmul.f32 %v300_v60, %v244_v10  ;;  %v303_v10 = vmul.f32 %v295_v41, %v2317_v30  ;;  %v176_v30 = vld [vmem:[%s3032_s3 + $0x20] sm:$0xff] }
 0x161   :  { %v313_v17 = vsub.f32 %v176_v30, %v305_v16  ;;  %v307_v18 = vmul.f32 %v299_v1, %v2331_v55 }
 0x162   :  { %v316_v8 = vsub.f32 %v179_v6, %v308_v5  ;;  %v311_v13 = vsub.f32 %v174_v12, %v303_v10 }
 0x163   :  { %v315_v19 = vsub.f32 %v178_v47, %v307_v18 }
 0x164   :  { %349 = vperm.xlu1 %2083, %v299_v1   ;;  %392 = vperm.xlu0 %2082, %v314_v2  }
 0x168   :  { %367 = vperm.xlu1 %2083, %v309_v7   ;;  %402 = vperm.xlu0 %2082, %v316_v8   ;;  %v424_v7 = vld [vmem:[%s3033_s4 + $0x18] sm:$0xff]  ;;  %v425_v8 = vld [vmem:[%s3033_s4 + $0x20] sm:$0xff] }
 0x16c   :  { %372 = vperm.xlu1 %2083, %v310_v23   ;;  %v428_v23 = vld [vmem:[%s3033_s4 + $0x38] sm:$0xff] }
 0x170   :  { %377 = vperm.xlu1 %2083, %v311_v13  }
 0x174   :  { %382 = vperm.xlu1 %2083, %v312_v15  }
 0x178   :  { %387 = vperm.xlu1 %2083, %v313_v17  }
 0x17c   :  { %397 = vperm.xlu1 %2083, %v315_v19  }
 0x1c9   :  { %v320_v26 = vpop.permute.xlu0 %319 }
 0x1ca   :  { %v357_v29 = vmul.f32 %v320_v26, %v2257_v24 }
 0x1d3   :  { %v325_v20 = vpop.permute.xlu1 %324 }
 0x1d4   :  { %v358_v32 = vmul.f32 %v325_v20, %v2261_v31 }
 0x1d7   :  { %v330_v21 = vpop.permute.xlu1 %329 }
 0x1d8   :  { %v359_v43 = vmul.f32 %v330_v21, %v2265_v38 }
 0x1db   :  { %v335_v22 = vpop.permute.xlu1 %334  ;;  %v345_v27 = vpop.permute.xlu0 %344 }
 0x1dc   :  { %v360_v48 = vmul.f32 %v335_v22, %v2267_v39  ;;  %v362_v24 = vmul.f32 %v345_v27, %v2279_v57 }
 0x1df   :  { %v340_v25 = vpop.permute.xlu1 %339  ;;  %v355_v34 = vpop.permute.xlu0 %354 }
 0x1e0   :  { %v361_v52 = vmul.f32 %v340_v25, %v2273_v50  ;;  %v364_v38 = vmul.f32 %v355_v34, %v2290_v3  ;;  %v422_v3 = vld [vmem:[%s3033_s4 + $0x8] sm:$0xff] }
 0x1e3   :  { %v350_v55 = vpop.permute.xlu1 %349  ;;  %v393_v46 = vpop.permute.xlu0 %392 }
 0x1e4   :  { %v410_v53 = vadd.f32 %v393_v46, %v362_v24  ;;  %v363_v39 = vmul.f32 %v350_v55, %v2275_v54  ;;  %v423_v54 = vld [vmem:[%s3033_s4 + $0x10] sm:$0xff] }
 0x1e6   :  { %v418_v0 = vmax.f32 %v410_v53, 0.0 }
 0x1e7   :  { %v368_v28 = vpop.permute.xlu1 %367  ;;  %v403_v60 = vpop.permute.xlu0 %402 }
 0x1e8   :  { %v405_v33 = vadd.f32 %v368_v28, %v357_v29  ;;  %v412_v1 = vadd.f32 %v403_v60, %v364_v38 }
 0x1ea   :  { %v413_v40 = vmax.f32 %v405_v33, 0.0  ;;  %v420_v50 = vmax.f32 %v412_v1, 0.0 }
 0x1eb   :  { %v373_v35 = vpop.permute.xlu1 %372 }
 0x1ec   :  { %v406_v36 = vadd.f32 %v373_v35, %v358_v32 }
 0x1ee   :  { %v414_v41 = vmax.f32 %v406_v36, 0.0 }
 0x1ef   :  { %v378_v42 = vpop.permute.xlu1 %377 }
 0x1f0   :  { %v2006_v45 = vpack.c.bf16 %v414_v41, %v413_v40  ;;  %v407_v49 = vadd.f32 %v378_v42, %v359_v43 }
 0x1f2   :  { %2007 = vmatprep.subr.bf16.mxu0 %v2006_v45  ;;  %v415_v58 = vmax.f32 %v407_v49, 0.0 }
 0x1f3   :  { %2009 = vmatpush3.bf16.msra.mxu0 %v2006_v45  ;;  %v383_v51 = vpop.permute.xlu1 %382 }
 0x1f4   :  { %v408_v31 = vadd.f32 %v383_v51, %v360_v48 }
 0x1f6   :  { %v416_v59 = vmax.f32 %v408_v31, 0.0 }
 0x1f7   :  { %v388_v61 = vpop.permute.xlu1 %387 }
 0x1f8   :  { %v409_v62 = vadd.f32 %v388_v61, %v361_v52  ;;  %v2010_v63 = vpack.c.bf16 %v416_v59, %v415_v58 }
 0x1fa   :  { %v417_v2 = vmax.f32 %v409_v62, 0.0  ;;  %2011 = vmatprep.subr.bf16.mxu0 %v2010_v63 }
 0x1fb   :  { %2013 = vmatpush3.bf16.msra.mxu0 %v2010_v63  ;;  %v398_v57 = vpop.permute.xlu1 %397 }
 0x1fc   :  { %v411_v4 = vadd.f32 %v398_v57, %v363_v39  ;;  %v2014_v5 = vpack.c.bf16 %v418_v0, %v417_v2 }
 0x1fe   :  { %v419_v56 = vmax.f32 %v411_v4, 0.0  ;;  %2015 = vmatprep.subr.bf16.mxu0 %v2014_v5 }
 0x1ff   :  { %2017 = vmatpush3.bf16.msra.mxu0 %v2014_v5 }
 0x200   :  { %v2018_v6 = vpack.c.bf16 %v420_v50, %v419_v56 }
 0x202   :  { %2019 = vmatprep.subr.bf16.mxu0 %v2018_v6 }
 0x203   :  { %2021 = vmatpush3.bf16.msra.mxu0 %v2018_v6 }
 0x206   :  { %1911 = vmatmul.mubr.msk.f32.vlgmr.msra.gmra.mrb[0].mxu0 %vm429_vm1, %v422_v3 }
 0x207   :  { %1913 = vmatprep.mubr.msk.f32.mxu0 %vm429_vm1, %v423_v54 }
 0x20a   :  { %1914 = vmatmul.mubr.msk.f32.gmra.mrb[2].mxu0 %vm429_vm1, %v424_v7 }
 0x20b   :  { %1916 = vmatprep.mubr.msk.f32.mxu0 %vm429_vm1, %v425_v8 }
 0x20e   :  { %1917 = vmatmul.mubr.msk.f32.gmra.mrb[4].mxu0 %vm429_vm1, %v426_v9 }
 0x20f   :  { %1919 = vmatprep.mubr.msk.f32.mxu0 %vm429_vm1, %v427_v11 }
 0x212   :  { %1920 = vmatmul.mubr.msk.f32.gmra.mrb[6].mxu0 %vm429_vm1, %v428_v23 }
 0x2d9   :  { %v2436_v10 = vpop.f32.mrb[0].mxu0 }
 0x2da   :  { %v2438_v12 = vpop.f32.mrb[1].mxu0  ;;  %v578_v13 = vsel %vm180_vm0, %v2436_v10, 0.0  ;;  %v600_v15 = vmul.f32 %v2436_v10, %v2436_v10 }
 0x2db   :  { %579 = vadd.xlane.f32.xlu0 %v578_v13  ;;  %v575_v14 = vsel %vm180_vm0, %v2438_v12, 0.0  ;;  %v599_v37 = vmul.f32 %v2438_v12, %v2438_v12 }
 0x2dc   :  { %576 = vadd.xlane.f32.xlu1 %v575_v14  ;;  %v610_v18 = vsel %vm180_vm0, %v600_v15, 0.0 }
 0x2dd   :  { %v607_v16 = vsel %vm180_vm0, %v599_v37, 0.0  ;;  %v2449_v30 = vpop.f32.mrb[2].mxu0 }
 0x2de   :  { %v2451_v17 = vpop.f32.mrb[3].mxu0  ;;  %v584_v19 = vsel %vm180_vm0, %v2449_v30, 0.0  ;;  %v602_v22 = vmul.f32 %v2449_v30, %v2449_v30 }
 0x2df   :  { %608 = vadd.xlane.f32.xlu0 %v607_v16  ;;  %v581_v47 = vsel %vm180_vm0, %v2451_v17, 0.0  ;;  %v601_v20 = vmul.f32 %v2451_v17, %v2451_v17 }
 0x2e0   :  { %611 = vadd.xlane.f32.xlu1 %v610_v18  ;;  %v616_v27 = vsel %vm180_vm0, %v602_v22, 0.0 }
 0x2e1   :  { %v2458_v44 = vpop.f32.mrb[4].mxu0  ;;  %v613_v26 = vsel %vm180_vm0, %v601_v20, 0.0  ;;  %v559_v20 = vld [vmem:[%s3034_s5] sm:$0xff] }
 0x2e2   :  { %v2462_v21 = vpop.f32.mrb[5].mxu0  ;;  %v590_v29 = vsel %vm180_vm0, %v2458_v44, 0.0  ;;  %v604_v33 = vmul.f32 %v2458_v44, %v2458_v44 }
 0x2e3   :  { %582 = vadd.xlane.f32.xlu0 %v581_v47  ;;  %v587_v28 = vsel %vm180_vm0, %v2462_v21, 0.0  ;;  %v603_v32 = vmul.f32 %v2462_v21, %v2462_v21 }
 0x2e4   :  { %585 = vadd.xlane.f32.xlu1 %v584_v19  ;;  %v622_v35 = vsel %vm180_vm0, %v604_v33, 0.0 }
 0x2e5   :  { %v2466_v25 = vpop.f32.mrb[6].mxu0  ;;  %v619_v34 = vsel %vm180_vm0, %v603_v32, 0.0 }
 0x2e6   :  { %v2469_v55 = vpop.f32.mrb[7].mxu0  ;;  %v596_v40 = vsel %vm180_vm0, %v2466_v25, 0.0  ;;  %v606_v42 = vmul.f32 %v2466_v25, %v2466_v25 }
 0x2e7   :  { %614 = vadd.xlane.f32.xlu0 %v613_v26  ;;  %v593_v36 = vsel %vm180_vm0, %v2469_v55, 0.0  ;;  %v605_v41 = vmul.f32 %v2469_v55, %v2469_v55 }
 0x2e8   :  { %617 = vadd.xlane.f32.xlu1 %v616_v27  ;;  %v628_v45 = vsel %vm180_vm0, %v606_v42, 0.0  ;;  %v560_v27 = vld [vmem:[%s3034_s5 + $0x8] sm:$0xff] }
 0x2e9   :  { %v625_v43 = vsel %vm180_vm0, %v605_v41, 0.0 }
 0x2eb   :  { %588 = vadd.xlane.f32.xlu0 %v587_v28 }
 0x2ec   :  { %591 = vadd.xlane.f32.xlu1 %v590_v29 }
 0x2ef   :  { %620 = vadd.xlane.f32.xlu0 %v619_v34 }
 0x2f0   :  { %623 = vadd.xlane.f32.xlu1 %v622_v35 }
 0x2f3   :  { %594 = vadd.xlane.f32.xlu0 %v593_v36 }
 0x2f4   :  { %597 = vadd.xlane.f32.xlu1 %v596_v40 }
 0x2f7   :  { %626 = vadd.xlane.f32.xlu0 %v625_v43  ;;  %v567_v43 = vld [vmem:[%s3035_s6] sm:$0xff] }
 0x2f8   :  { %629 = vadd.xlane.f32.xlu1 %v628_v45 }
 0x368   :  { %v580_v46 = vpop.xlane.xlu0 %579 }
 0x369   :  { %v577_v48 = vpop.xlane.xlu1 %576  ;;  %v2492_v49 = vmul.f32 0.125, %v580_v46 }
 0x36a   :  { %v631_v51 = vmul.f32 0.125, %v577_v48 }
 0x36b   :  { %v648_v58 = vmul.f32 %v2492_v49, %v2492_v49 }
 0x36c   :  { %v647_v24 = vmul.f32 %v631_v51, %v631_v51  ;;  %v609_v31 = vpop.xlane.xlu0 %608 }
 0x36d   :  { %v639_v52 = vmul.f32 0.125, %v609_v31  ;;  %v612_v53 = vpop.xlane.xlu1 %611 }
 0x36e   :  { %v640_v59 = vmul.f32 0.125, %v612_v53 }
 0x36f   :  { %v655_v60 = vsub.f32 %v639_v52, %v647_v24  ;;  %v568_v24 = vld [vmem:[%s3035_s6 + $0x8] sm:$0xff] }
 0x370   :  { %v656_v61 = vsub.f32 %v640_v59, %v648_v58  ;;  %v583_v38 = vpop.xlane.xlu0 %582 }
 0x371   :  { %v663_v62 = vmax.f32 %v655_v60, 0.0  ;;  %v2496_v63 = vmul.f32 0.125, %v583_v38  ;;  %v586_v0 = vpop.xlane.xlu1 %585 }
 0x372   :  { %v664_v39 = vmax.f32 %v656_v61, 0.0  ;;  %v2498_v1 = vmul.f32 0.125, %v586_v0 }
 0x373   :  { %v671_v2 = vadd.f32 1e-05, %v663_v62  ;;  %v649_v5 = vmul.f32 %v2496_v63, %v2496_v63 }
 0x374   :  { %v672_v57 = vadd.f32 1e-05, %v664_v39  ;;  %v615_v4 = vpop.xlane.xlu0 %614  ;;  %v650_v6 = vmul.f32 %v2498_v1, %v2498_v1 }
 0x375   :  { %2100 = vrsqrt.f32 %v671_v2  ;;  %v641_v50 = vmul.f32 0.125, %v615_v4  ;;  %v618_v56 = vpop.xlane.xlu1 %617 }
 0x376   :  { %2102 = vrsqrt.f32 %v672_v57  ;;  %v642_v3 = vmul.f32 0.125, %v618_v56 }
 0x377   :  { %v657_v54 = vsub.f32 %v641_v50, %v649_v5 }
 0x378   :  { %v658_v7 = vsub.f32 %v642_v3, %v650_v6  ;;  %v589_v8 = vpop.xlane.xlu0 %588  ;;  %v569_v3 = vld [vmem:[%s3035_s6 + $0x10] sm:$0xff] }
 0x379   :  { %v665_v9 = vmax.f32 %v657_v54, 0.0  ;;  %v2504_v11 = vmul.f32 0.125, %v589_v8  ;;  %v592_v23 = vpop.xlane.xlu1 %591  ;;  %v570_v8 = vld [vmem:[%s3035_s6 + $0x18] sm:$0xff] }
 0x37a   :  { %v666_v13 = vmax.f32 %v658_v7, 0.0  ;;  %v2506_v14 = vmul.f32 0.125, %v592_v23 }
 0x37b   :  { %v673_v37 = vadd.f32 1e-05, %v665_v9  ;;  %v651_v18 = vmul.f32 %v2504_v11, %v2504_v11 }
 0x37c   :  { %v674_v15 = vadd.f32 1e-05, %v666_v13  ;;  %v621_v16 = vpop.xlane.xlu0 %620  ;;  %v652_v22 = vmul.f32 %v2506_v14, %v2506_v14 }
 0x37d   :  { %2104 = vrsqrt.f32 %v673_v37  ;;  %v643_v47 = vmul.f32 0.125, %v621_v16  ;;  %v624_v19 = vpop.xlane.xlu1 %623  ;;  %v563_v16 = vld [vmem:[%s3034_s5 + $0x20] sm:$0xff] }
 0x37e   :  { %2106 = vrsqrt.f32 %v674_v15  ;;  %v644_v26 = vmul.f32 0.125, %v624_v19 }
 0x37f   :  { %v2101_v28 = vpop.eup %2100  ;;  %v659_v29 = vsub.f32 %v643_v47, %v651_v18 }
 0x380   :  { %v2103_v32 = vpop.eup %2102  ;;  %v660_v33 = vsub.f32 %v644_v26, %v652_v22  ;;  %v595_v34 = vpop.xlane.xlu0 %594  ;;  %v687_v35 = vmul.f32 %v2101_v28, %v559_v20  ;;  %v572_v26 = vld [vmem:[%s3035_s6 + $0x28] sm:$0xff] }
 0x381   :  { %v667_v36 = vmax.f32 %v659_v29, 0.0  ;;  %v2518_v40 = vmul.f32 0.125, %v595_v34  ;;  %v598_v41 = vpop.xlane.xlu1 %597  ;;  %v688_v42 = vmul.f32 %v2103_v32, %v560_v27  ;;  %v565_v32 = vld [vmem:[%s3034_s5 + $0x30] sm:$0xff] }
 0x382   :  { %v668_v45 = vmax.f32 %v660_v33, 0.0  ;;  %v2523_v46 = vmul.f32 0.125, %v598_v41  ;;  %713 = vperm.xlu0 %2082, %v687_v35   ;;  %v695_v48 = vmul.f32 %v687_v35, %v631_v51  ;;  %v561_v51 = vld [vmem:[%s3034_s5 + $0x10] sm:$0xff]  ;;  %v566_v33 = vld [vmem:[%s3034_s5 + $0x38] sm:$0xff] }
 0x383   :  { %v675_v31 = vadd.f32 1e-05, %v667_v36  ;;  %718 = vperm.xlu1 %2083, %v688_v42   ;;  %v696_v52 = vmul.f32 %v688_v42, %v2492_v49  ;;  %v653_v60 = vmul.f32 %v2518_v40, %v2518_v40  ;;  %v562_v49 = vld [vmem:[%s3034_s5 + $0x18] sm:$0xff] }
 0x384   :  { %v676_v53 = vadd.f32 1e-05, %v668_v45  ;;  %v627_v58 = vpop.xlane.xlu0 %626  ;;  %v703_v59 = vsub.f32 %v567_v43, %v695_v48  ;;  %v654_v0 = vmul.f32 %v2523_v46, %v2523_v46  ;;  %v574_v41 = vld [vmem:[%s3035_s6 + $0x38] sm:$0xff] }
 0x385   :  { %2108 = vrsqrt.f32 %v675_v31  ;;  %v645_v61 = vmul.f32 0.125, %v627_v58  ;;  %v630_v38 = vpop.xlane.xlu1 %629  ;;  %v704_v62 = vsub.f32 %v568_v24, %v696_v52  ;;  %v815_v24 = vld [vmem:[%s3036_s7] sm:$0xff] }
 0x386   :  { %2110 = vrsqrt.f32 %v676_v53  ;;  %v646_v39 = vmul.f32 0.125, %v630_v38  ;;  %1938 = vmatprep.mubr.msk.f32.mxu1 %vm429_vm1, %v815_v24 }
 0x387   :  { %v2105_v2 = vpop.eup %2104  ;;  %v661_v57 = vsub.f32 %v645_v61, %v653_v60  ;;  %761 = vperm.xlu1 %2083, %v703_v59   ;;  %766 = vperm.xlu0 %2082, %v704_v62  }
 0x388   :  { %v2107_v4 = vpop.eup %2106  ;;  %v662_v5 = vsub.f32 %v646_v39, %v654_v0  ;;  %v689_v50 = vmul.f32 %v2105_v2, %v561_v51 }
 0x389   :  { %v669_v56 = vmax.f32 %v661_v57, 0.0  ;;  %v690_v6 = vmul.f32 %v2107_v4, %v562_v49 }
 0x38a   :  { %v670_v54 = vmax.f32 %v662_v5, 0.0  ;;  %v697_v7 = vmul.f32 %v689_v50, %v2496_v63  ;;  %v564_v63 = vld [vmem:[%s3034_s5 + $0x28] sm:$0xff] }
 0x38b   :  { %v677_v9 = vadd.f32 1e-05, %v669_v56  ;;  %723 = vperm.xlu1 %2083, %v689_v50   ;;  %728 = vperm.xlu0 %2082, %v690_v6   ;;  %v698_v23 = vmul.f32 %v690_v6, %v2498_v1  ;;  %v571_v1 = vld [vmem:[%s3035_s6 + $0x20] sm:$0xff] }
 0x38c   :  { %v678_v13 = vadd.f32 1e-05, %v670_v54  ;;  %v705_v37 = vsub.f32 %v569_v3, %v697_v7 }
 0x38d   :  { %2112 = vrsqrt.f32 %v677_v9  ;;  %v706_v15 = vsub.f32 %v570_v8, %v698_v23 }
 0x38e   :  { %2114 = vrsqrt.f32 %v678_v13 }
 0x38f   :  { %v2109_v18 = vpop.eup %2108  ;;  %771 = vperm.xlu1 %2083, %v705_v37   ;;  %776 = vperm.xlu0 %2082, %v706_v15  }
 0x390   :  { %v2111_v47 = vpop.eup %2110  ;;  %v691_v19 = vmul.f32 %v2109_v18, %v563_v16 }
 0x391   :  { %v692_v20 = vmul.f32 %v2111_v47, %v564_v63 }
 0x392   :  { %v699_v22 = vmul.f32 %v691_v19, %v2504_v11 }
 0x393   :  { %733 = vperm.xlu1 %2083, %v691_v19   ;;  %738 = vperm.xlu0 %2082, %v692_v20   ;;  %v700_v27 = vmul.f32 %v692_v20, %v2506_v14  ;;  %v573_v14 = vld [vmem:[%s3035_s6 + $0x30] sm:$0xff] }
 0x394   :  { %v707_v28 = vsub.f32 %v571_v1, %v699_v22  ;;  %v816_v22 = vld [vmem:[%s3036_s7 + $0x8] sm:$0xff] }
 0x395   :  { %v708_v29 = vsub.f32 %v572_v26, %v700_v27  ;;  %v819_v26 = vld [vmem:[%s3036_s7 + $0x20] sm:$0xff]  ;;  %v820_v27 = vld [vmem:[%s3036_s7 + $0x28] sm:$0xff] }
 0x397   :  { %v2113_v34 = vpop.eup %2112  ;;  %781 = vperm.xlu1 %2083, %v707_v28   ;;  %786 = vperm.xlu0 %2082, %v708_v29   ;;  %v821_v28 = vld [vmem:[%s3036_s7 + $0x30] sm:$0xff]  ;;  %v822_v29 = vld [vmem:[%s3036_s7 + $0x38] sm:$0xff] }
 0x398   :  { %v2115_v11 = vpop.eup %2114  ;;  %v693_v35 = vmul.f32 %v2113_v34, %v565_v32 }
 0x399   :  { %v694_v36 = vmul.f32 %v2115_v11, %v566_v33 }
 0x39a   :  { %v701_v42 = vmul.f32 %v693_v35, %v2518_v40 }
 0x39b   :  { %748 = vperm.xlu0 %2082, %v694_v36   ;;  %743 = vperm.xlu1 %2083, %v693_v35   ;;  %v702_v43 = vmul.f32 %v694_v36, %v2523_v46 }
 0x39c   :  { %v709_v45 = vsub.f32 %v573_v14, %v701_v42 }
 0x39d   :  { %v710_v48 = vsub.f32 %v574_v41, %v702_v43 }
 0x39f   :  { %796 = vperm.xlu0 %2082, %v710_v48   ;;  %791 = vperm.xlu1 %2083, %v709_v45  }
 0x401   :  { %v714_v31 = vpop.permute.xlu0 %713 }
 0x402   :  { %v719_v52 = vpop.permute.xlu1 %718  ;;  %v751_v53 = vmul.f32 %v714_v31, %v2438_v12 }
 0x403   :  { %v752_v40 = vmul.f32 %v2436_v10, %v719_v52 }
 0x406   :  { %v762_v58 = vpop.permute.xlu1 %761  ;;  %v767_v59 = vpop.permute.xlu0 %766 }
 0x407   :  { %v799_v60 = vadd.f32 %v762_v58, %v751_v53  ;;  %v800_v46 = vadd.f32 %v767_v59, %v752_v40 }
 0x409   :  { %v807_v61 = vmax.f32 %v799_v60, 0.0  ;;  %v808_v38 = vmax.f32 %v800_v46, 0.0 }
 0x40a   :  { %v724_v62 = vpop.permute.xlu1 %723  ;;  %v729_v51 = vpop.permute.xlu0 %728 }
 0x40b   :  { %v2022_v0 = vpack.c.bf16 %v808_v38, %v807_v61  ;;  %v753_v39 = vmul.f32 %v724_v62, %v2451_v17  ;;  %v754_v49 = vmul.f32 %v2449_v30, %v729_v51 }
 0x40d   :  { %2023 = vmatprep.subr.bf16.mxu1 %v2022_v0 }
 0x40e   :  { %v772_v2 = vpop.permute.xlu1 %771  ;;  %2025 = vmatpush3.bf16.msra.mxu1 %v2022_v0  ;;  %v777_v57 = vpop.permute.xlu0 %776 }
 0x40f   :  { %v801_v12 = vadd.f32 %v772_v2, %v753_v39  ;;  %v802_v4 = vadd.f32 %v777_v57, %v754_v49 }
 0x411   :  { %v809_v10 = vmax.f32 %v801_v12, 0.0  ;;  %v810_v5 = vmax.f32 %v802_v4, 0.0 }
 0x412   :  { %v734_v50 = vpop.permute.xlu1 %733  ;;  %v739_v56 = vpop.permute.xlu0 %738 }
 0x413   :  { %v2026_v6 = vpack.c.bf16 %v810_v5, %v809_v10  ;;  %v755_v3 = vmul.f32 %v734_v50, %v2462_v21  ;;  %v756_v54 = vmul.f32 %v2458_v44, %v739_v56 }
 0x415   :  { %2027 = vmatprep.subr.bf16.mxu1 %v2026_v6 }
 0x416   :  { %v782_v7 = vpop.permute.xlu1 %781  ;;  %2029 = vmatpush3.bf16.msra.mxu1 %v2026_v6  ;;  %v787_v17 = vpop.permute.xlu0 %786 }
 0x417   :  { %v803_v30 = vadd.f32 %v782_v7, %v755_v3  ;;  %v804_v8 = vadd.f32 %v787_v17, %v756_v54 }
 0x419   :  { %v811_v9 = vmax.f32 %v803_v30, 0.0  ;;  %v812_v23 = vmax.f32 %v804_v8, 0.0 }
 0x41a   :  { %v744_v13 = vpop.permute.xlu1 %743  ;;  %v749_v37 = vpop.permute.xlu0 %748 }
 0x41b   :  { %v2030_v15 = vpack.c.bf16 %v812_v23, %v811_v9  ;;  %v757_v16 = vmul.f32 %v744_v13, %v2469_v55  ;;  %v758_v63 = vmul.f32 %v2466_v25, %v749_v37  ;;  %v817_v55 = vld [vmem:[%s3036_s7 + $0x10] sm:$0xff]  ;;  %v818_v25 = vld [vmem:[%s3036_s7 + $0x18] sm:$0xff] }
 0x41d   :  { %2031 = vmatprep.subr.bf16.mxu1 %v2030_v15 }
 0x41e   :  { %v792_v18 = vpop.permute.xlu1 %791  ;;  %2033 = vmatpush3.bf16.msra.mxu1 %v2030_v15  ;;  %v797_v21 = vpop.permute.xlu0 %796 }
 0x41f   :  { %v805_v44 = vadd.f32 %v792_v18, %v757_v16  ;;  %v806_v47 = vadd.f32 %v797_v21, %v758_v63 }
 0x421   :  { %v813_v19 = vmax.f32 %v805_v44, 0.0  ;;  %v814_v20 = vmax.f32 %v806_v47, 0.0 }
 0x423   :  { %v2034_v1 = vpack.c.bf16 %v814_v20, %v813_v19 }
 0x425   :  { %2035 = vmatprep.subr.bf16.mxu1 %v2034_v1 }
 0x426   :  { %2037 = vmatpush3.bf16.msra.mxu1 %v2034_v1 }
 0x429   :  { %1939 = vmatmul.mubr.msk.f32.vlgmr.msra.gmra.mrb[0].mxu1 %vm429_vm1, %v816_v22 }
 0x42a   :  { %1941 = vmatprep.mubr.msk.f32.mxu1 %vm429_vm1, %v817_v55 }
 0x42d   :  { %1942 = vmatmul.mubr.msk.f32.gmra.mrb[2].mxu1 %vm429_vm1, %v818_v25 }
 0x42e   :  { %1944 = vmatprep.mubr.msk.f32.mxu1 %vm429_vm1, %v819_v26 }
 0x431   :  { %1945 = vmatmul.mubr.msk.f32.gmra.mrb[4].mxu1 %vm429_vm1, %v820_v27 }
 0x432   :  { %1947 = vmatprep.mubr.msk.f32.mxu1 %vm429_vm1, %v821_v28 }
 0x435   :  { %1948 = vmatmul.mubr.msk.f32.gmra.mrb[6].mxu1 %vm429_vm1, %v822_v29 }
 0x4fc   :  { %v2615_v32 = vpop.f32.mrb[0].mxu1 }
 0x4fd   :  { %v2617_v33 = vpop.f32.mrb[1].mxu1  ;;  %v971_v34 = vsel %vm180_vm0, %v2615_v32, 0.0  ;;  %v993_v36 = vmul.f32 %v2615_v32, %v2615_v32 }
 0x4fe   :  { %972 = vadd.xlane.f32.xlu0 %v971_v34  ;;  %v968_v11 = vsel %vm180_vm0, %v2617_v33, 0.0  ;;  %v992_v35 = vmul.f32 %v2617_v33, %v2617_v33 }
 0x4ff   :  { %969 = vadd.xlane.f32.xlu1 %v968_v11  ;;  %v1003_v43 = vsel %vm180_vm0, %v993_v36, 0.0 }
 0x500   :  { %v1000_v14 = vsel %vm180_vm0, %v992_v35, 0.0  ;;  %v2628_v41 = vpop.f32.mrb[2].mxu1 }
 0x501   :  { %v2630_v42 = vpop.f32.mrb[3].mxu1  ;;  %v977_v48 = vsel %vm180_vm0, %v2628_v41, 0.0  ;;  %v995_v53 = vmul.f32 %v2628_v41, %v2628_v41 }
 0x502   :  { %1001 = vadd.xlane.f32.xlu0 %v1000_v14  ;;  %v974_v45 = vsel %vm180_vm0, %v2630_v42, 0.0  ;;  %v994_v31 = vmul.f32 %v2630_v42, %v2630_v42 }
 0x503   :  { %1004 = vadd.xlane.f32.xlu1 %v1003_v43  ;;  %v1009_v60 = vsel %vm180_vm0, %v995_v53, 0.0 }
 0x504   :  { %v2637_v24 = vpop.f32.mrb[4].mxu1  ;;  %v1006_v58 = vsel %vm180_vm0, %v994_v31, 0.0  ;;  %v952_v31 = vld [vmem:[%s3037_s8] sm:$0xff] }
 0x505   :  { %v2641_v52 = vpop.f32.mrb[5].mxu1  ;;  %v983_v61 = vsel %vm180_vm0, %v2637_v24, 0.0  ;;  %v997_v62 = vmul.f32 %v2637_v24, %v2637_v24 }
 0x506   :  { %975 = vadd.xlane.f32.xlu0 %v974_v45  ;;  %v980_v46 = vsel %vm180_vm0, %v2641_v52, 0.0  ;;  %v996_v38 = vmul.f32 %v2641_v52, %v2641_v52 }
 0x507   :  { %978 = vadd.xlane.f32.xlu1 %v977_v48  ;;  %v1015_v0 = vsel %vm180_vm0, %v997_v62, 0.0 }
 0x508   :  { %v2645_v40 = vpop.f32.mrb[6].mxu1  ;;  %v1012_v51 = vsel %vm180_vm0, %v996_v38, 0.0 }
 0x509   :  { %v2648_v59 = vpop.f32.mrb[7].mxu1  ;;  %v989_v49 = vsel %vm180_vm0, %v2645_v40, 0.0  ;;  %v999_v57 = vmul.f32 %v2645_v40, %v2645_v40 }
 0x50a   :  { %1007 = vadd.xlane.f32.xlu0 %v1006_v58  ;;  %v986_v39 = vsel %vm180_vm0, %v2648_v59, 0.0  ;;  %v998_v2 = vmul.f32 %v2648_v59, %v2648_v59 }
 0x50b   :  { %1010 = vadd.xlane.f32.xlu1 %v1009_v60  ;;  %v1021_v4 = vsel %vm180_vm0, %v999_v57, 0.0  ;;  %v953_v60 = vld [vmem:[%s3037_s8 + $0x8] sm:$0xff] }
 0x50c   :  { %v1018_v12 = vsel %vm180_vm0, %v998_v2, 0.0 }
 0x50e   :  { %981 = vadd.xlane.f32.xlu0 %v980_v46 }
 0x50f   :  { %984 = vadd.xlane.f32.xlu1 %v983_v61 }
 0x512   :  { %1013 = vadd.xlane.f32.xlu0 %v1012_v51 }
 0x513   :  { %1016 = vadd.xlane.f32.xlu1 %v1015_v0 }
 0x516   :  { %987 = vadd.xlane.f32.xlu0 %v986_v39 }
 0x517   :  { %990 = vadd.xlane.f32.xlu1 %v989_v49 }
 0x51a   :  { %1019 = vadd.xlane.f32.xlu0 %v1018_v12  ;;  %v960_v12 = vld [vmem:[%s3038_s9] sm:$0xff] }
 0x51b   :  { %1022 = vadd.xlane.f32.xlu1 %v1021_v4 }
 0x58b   :  { %v973_v10 = vpop.xlane.xlu0 %972 }
 0x58c   :  { %v970_v5 = vpop.xlane.xlu1 %969  ;;  %v2671_v50 = vmul.f32 0.125, %v973_v10 }
 0x58d   :  { %v1024_v56 = vmul.f32 0.125, %v970_v5 }
 0x58e   :  { %v1041_v17 = vmul.f32 %v2671_v50, %v2671_v50 }
 0x58f   :  { %v1040_v6 = vmul.f32 %v1024_v56, %v1024_v56  ;;  %v1002_v3 = vpop.xlane.xlu0 %1001 }
 0x590   :  { %v1032_v54 = vmul.f32 0.125, %v1002_v3  ;;  %v1005_v7 = vpop.xlane.xlu1 %1004 }
 0x591   :  { %v1033_v30 = vmul.f32 0.125, %v1005_v7 }
 0x592   :  { %v1048_v8 = vsub.f32 %v1032_v54, %v1040_v6  ;;  %v961_v6 = vld [vmem:[%s3038_s9 + $0x8] sm:$0xff] }
 0x593   :  { %v1049_v9 = vsub.f32 %v1033_v30, %v1041_v17  ;;  %v976_v23 = vpop.xlane.xlu0 %975 }
 0x594   :  { %v1056_v13 = vmax.f32 %v1048_v8, 0.0  ;;  %v2675_v37 = vmul.f32 0.125, %v976_v23  ;;  %v979_v15 = vpop.xlane.xlu1 %978 }
 0x595   :  { %v1057_v16 = vmax.f32 %v1049_v9, 0.0  ;;  %v2677_v63 = vmul.f32 0.125, %v979_v15 }
 0x596   :  { %v1064_v18 = vadd.f32 1e-05, %v1056_v13  ;;  %v1042_v47 = vmul.f32 %v2675_v37, %v2675_v37 }
 0x597   :  { %v1065_v21 = vadd.f32 1e-05, %v1057_v16  ;;  %v1008_v44 = vpop.xlane.xlu0 %1007  ;;  %v1043_v1 = vmul.f32 %v2677_v63, %v2677_v63 }
 0x598   :  { %2116 = vrsqrt.f32 %v1064_v18  ;;  %v1034_v19 = vmul.f32 0.125, %v1008_v44  ;;  %v1011_v20 = vpop.xlane.xlu1 %1010 }
 0x599   :  { %2118 = vrsqrt.f32 %v1065_v21  ;;  %v1035_v22 = vmul.f32 0.125, %v1011_v20 }
 0x59a   :  { %v1050_v55 = vsub.f32 %v1034_v19, %v1042_v47 }
 0x59b   :  { %v1051_v25 = vsub.f32 %v1035_v22, %v1043_v1  ;;  %v982_v26 = vpop.xlane.xlu0 %981  ;;  %v962_v22 = vld [vmem:[%s3038_s9 + $0x10] sm:$0xff] }
 0x59c   :  { %v1058_v27 = vmax.f32 %v1050_v55, 0.0  ;;  %v2683_v28 = vmul.f32 0.125, %v982_v26  ;;  %v985_v29 = vpop.xlane.xlu1 %984  ;;  %v963_v26 = vld [vmem:[%s3038_s9 + $0x18] sm:$0xff] }
 0x59d   :  { %v1059_v34 = vmax.f32 %v1051_v25, 0.0  ;;  %v2685_v11 = vmul.f32 0.125, %v985_v29 }
 0x59e   :  { %v1066_v35 = vadd.f32 1e-05, %v1058_v27  ;;  %v1044_v43 = vmul.f32 %v2683_v28, %v2683_v28 }
 0x59f   :  { %v1067_v36 = vadd.f32 1e-05, %v1059_v34  ;;  %v1014_v14 = vpop.xlane.xlu0 %1013  ;;  %v1045_v53 = vmul.f32 %v2685_v11, %v2685_v11 }
 0x5a0   :  { %2120 = vrsqrt.f32 %v1066_v35  ;;  %v1036_v45 = vmul.f32 0.125, %v1014_v14  ;;  %v1017_v48 = vpop.xlane.xlu1 %1016  ;;  %v956_v14 = vld [vmem:[%s3037_s8 + $0x20] sm:$0xff] }
 0x5a1   :  { %2122 = vrsqrt.f32 %v1067_v36  ;;  %v1037_v58 = vmul.f32 0.125, %v1017_v48 }
 0x5a2   :  { %v2117_v46 = vpop.eup %2116  ;;  %v1052_v61 = vsub.f32 %v1036_v45, %v1044_v43 }
 0x5a3   :  { %v2119_v38 = vpop.eup %2118  ;;  %v1053_v62 = vsub.f32 %v1037_v58, %v1045_v53  ;;  %v988_v51 = vpop.xlane.xlu0 %987  ;;  %v1080_v0 = vmul.f32 %v2117_v46, %v952_v31  ;;  %v965_v58 = vld [vmem:[%s3038_s9 + $0x28] sm:$0xff] }
 0x5a4   :  { %v1060_v39 = vmax.f32 %v1052_v61, 0.0  ;;  %v2697_v49 = vmul.f32 0.125, %v988_v51  ;;  %v991_v2 = vpop.xlane.xlu1 %990  ;;  %v1081_v57 = vmul.f32 %v2119_v38, %v953_v60  ;;  %v958_v38 = vld [vmem:[%s3037_s8 + $0x30] sm:$0xff] }
 0x5a5   :  { %v1061_v4 = vmax.f32 %v1053_v62, 0.0  ;;  %v2702_v10 = vmul.f32 0.125, %v991_v2  ;;  %v1088_v5 = vmul.f32 %v1080_v0, %v1024_v56  ;;  %1106 = vperm.xlu0 %2082, %v1080_v0   ;;  %v954_v56 = vld [vmem:[%s3037_s8 + $0x10] sm:$0xff]  ;;  %v959_v62 = vld [vmem:[%s3037_s8 + $0x38] sm:$0xff] }
 0x5a6   :  { %v1068_v3 = vadd.f32 1e-05, %v1060_v39  ;;  %1111 = vperm.xlu1 %2083, %v1081_v57   ;;  %v1089_v54 = vmul.f32 %v1081_v57, %v2671_v50  ;;  %v1046_v8 = vmul.f32 %v2697_v49, %v2697_v49  ;;  %v955_v50 = vld [vmem:[%s3037_s8 + $0x18] sm:$0xff] }
 0x5a7   :  { %v1069_v7 = vadd.f32 1e-05, %v1061_v4  ;;  %v1020_v17 = vpop.xlane.xlu0 %1019  ;;  %v1096_v30 = vsub.f32 %v960_v12, %v1088_v5  ;;  %v1047_v15 = vmul.f32 %v2702_v10, %v2702_v10  ;;  %v967_v2 = vld [vmem:[%s3038_s9 + $0x38] sm:$0xff] }
 0x5a8   :  { %2124 = vrsqrt.f32 %v1068_v3  ;;  %v1038_v9 = vmul.f32 0.125, %v1020_v17  ;;  %v1023_v23 = vpop.xlane.xlu1 %1022  ;;  %v1097_v13 = vsub.f32 %v961_v6, %v1089_v54  ;;  %v1208_v6 = vld [vmem:[%s3039_s10] sm:$0xff] }
 0x5a9   :  { %2126 = vrsqrt.f32 %v1069_v7  ;;  %v1039_v16 = vmul.f32 0.125, %v1023_v23  ;;  %1966 = vmatprep.mubr.msk.f32.mxu0 %vm429_vm1, %v1208_v6 }
 0x5aa   :  { %v2121_v18 = vpop.eup %2120  ;;  %v1054_v21 = vsub.f32 %v1038_v9, %v1046_v8  ;;  %1154 = vperm.xlu1 %2083, %v1096_v30   ;;  %1159 = vperm.xlu0 %2082, %v1097_v13  }
 0x5ab   :  { %v2123_v44 = vpop.eup %2122  ;;  %v1055_v47 = vsub.f32 %v1039_v16, %v1047_v15  ;;  %v1082_v19 = vmul.f32 %v2121_v18, %v954_v56 }
 0x5ac   :  { %v1062_v20 = vmax.f32 %v1054_v21, 0.0  ;;  %v1083_v1 = vmul.f32 %v2123_v44, %v955_v50 }
 0x5ad   :  { %v1063_v55 = vmax.f32 %v1055_v47, 0.0  ;;  %v1090_v25 = vmul.f32 %v1082_v19, %v2675_v37  ;;  %v957_v37 = vld [vmem:[%s3037_s8 + $0x28] sm:$0xff] }
 0x5ae   :  { %v1070_v27 = vadd.f32 1e-05, %v1062_v20  ;;  %1116 = vperm.xlu1 %2083, %v1082_v19   ;;  %1121 = vperm.xlu0 %2082, %v1083_v1   ;;  %v1091_v29 = vmul.f32 %v1083_v1, %v2677_v63  ;;  %v964_v63 = vld [vmem:[%s3038_s9 + $0x20] sm:$0xff] }
 0x5af   :  { %v1071_v34 = vadd.f32 1e-05, %v1063_v55  ;;  %v1098_v35 = vsub.f32 %v962_v22, %v1090_v25 }
 0x5b0   :  { %2128 = vrsqrt.f32 %v1070_v27  ;;  %v1099_v36 = vsub.f32 %v963_v26, %v1091_v29 }
 0x5b1   :  { %2130 = vrsqrt.f32 %v1071_v34 }
 0x5b2   :  { %v2125_v43 = vpop.eup %2124  ;;  %1164 = vperm.xlu1 %2083, %v1098_v35   ;;  %1169 = vperm.xlu0 %2082, %v1099_v36  }
 0x5b3   :  { %v2127_v45 = vpop.eup %2126  ;;  %v1084_v48 = vmul.f32 %v2125_v43, %v956_v14 }
 0x5b4   :  { %v1085_v31 = vmul.f32 %v2127_v45, %v957_v37 }
 0x5b5   :  { %v1092_v53 = vmul.f32 %v1084_v48, %v2683_v28 }
 0x5b6   :  { %1126 = vperm.xlu1 %2083, %v1084_v48   ;;  %v1093_v60 = vmul.f32 %v1085_v31, %v2685_v11  ;;  %1131 = vperm.xlu0 %2082, %v1085_v31   ;;  %v966_v11 = vld [vmem:[%s3038_s9 + $0x30] sm:$0xff] }
 0x5b7   :  { %v1100_v46 = vsub.f32 %v964_v63, %v1092_v53  ;;  %v1209_v53 = vld [vmem:[%s3039_s10 + $0x8] sm:$0xff] }
 0x5b8   :  { %v1101_v61 = vsub.f32 %v965_v58, %v1093_v60  ;;  %v1212_v58 = vld [vmem:[%s3039_s10 + $0x20] sm:$0xff]  ;;  %v1213_v60 = vld [vmem:[%s3039_s10 + $0x28] sm:$0xff] }
 0x5ba   :  { %v2129_v51 = vpop.eup %2128  ;;  %1174 = vperm.xlu1 %2083, %v1100_v46   ;;  %1179 = vperm.xlu0 %2082, %v1101_v61   ;;  %v1214_v46 = vld [vmem:[%s3039_s10 + $0x30] sm:$0xff]  ;;  %v1215_v61 = vld [vmem:[%s3039_s10 + $0x38] sm:$0xff] }
 0x5bb   :  { %v2131_v28 = vpop.eup %2130  ;;  %v1086_v0 = vmul.f32 %v2129_v51, %v958_v38 }
 0x5bc   :  { %v1087_v39 = vmul.f32 %v2131_v28, %v959_v62 }
 0x5bd   :  { %v1094_v57 = vmul.f32 %v1086_v0, %v2697_v49 }
 0x5be   :  { %1141 = vperm.xlu0 %2082, %v1087_v39   ;;  %1136 = vperm.xlu1 %2083, %v1086_v0   ;;  %v1095_v12 = vmul.f32 %v1087_v39, %v2702_v10 }
 0x5bf   :  { %v1102_v4 = vsub.f32 %v966_v11, %v1094_v57 }
 0x5c0   :  { %v1103_v5 = vsub.f32 %v967_v2, %v1095_v12 }
 0x5c2   :  { %1189 = vperm.xlu0 %2082, %v1103_v5   ;;  %1184 = vperm.xlu1 %2083, %v1102_v4  }
 0x624   :  { %v1107_v3 = vpop.permute.xlu0 %1106 }
 0x625   :  { %v1112_v54 = vpop.permute.xlu1 %1111  ;;  %v1144_v7 = vmul.f32 %v1107_v3, %v2617_v33 }
 0x626   :  { %v1145_v49 = vmul.f32 %v2615_v32, %v1112_v54 }
 0x629   :  { %v1155_v17 = vpop.permute.xlu1 %1154  ;;  %v1160_v30 = vpop.permute.xlu0 %1159 }
 0x62a   :  { %v1192_v8 = vadd.f32 %v1155_v17, %v1144_v7  ;;  %v1193_v10 = vadd.f32 %v1160_v30, %v1145_v49 }
 0x62c   :  { %v1200_v9 = vmax.f32 %v1192_v8, 0.0  ;;  %v1201_v23 = vmax.f32 %v1193_v10, 0.0 }
 0x62d   :  { %v1117_v13 = vpop.permute.xlu1 %1116  ;;  %v1122_v56 = vpop.permute.xlu0 %1121 }
 0x62e   :  { %v2038_v15 = vpack.c.bf16 %v1201_v23, %v1200_v9  ;;  %v1146_v16 = vmul.f32 %v1117_v13, %v2630_v42  ;;  %v1147_v50 = vmul.f32 %v2628_v41, %v1122_v56 }
 0x630   :  { %2039 = vmatprep.subr.bf16.mxu0 %v2038_v15 }
 0x631   :  { %v1165_v18 = vpop.permute.xlu1 %1164  ;;  %2041 = vmatpush3.bf16.msra.mxu0 %v2038_v15  ;;  %v1170_v21 = vpop.permute.xlu0 %1169 }
 0x632   :  { %v1194_v33 = vadd.f32 %v1165_v18, %v1146_v16  ;;  %v1195_v44 = vadd.f32 %v1170_v21, %v1147_v50 }
 0x634   :  { %v1202_v32 = vmax.f32 %v1194_v33, 0.0  ;;  %v1203_v47 = vmax.f32 %v1195_v44, 0.0 }
 0x635   :  { %v1127_v19 = vpop.permute.xlu1 %1126  ;;  %v1132_v20 = vpop.permute.xlu0 %1131 }
 0x636   :  { %v2042_v1 = vpack.c.bf16 %v1203_v47, %v1202_v32  ;;  %v1148_v22 = vmul.f32 %v1127_v19, %v2641_v52  ;;  %v1149_v55 = vmul.f32 %v2637_v24, %v1132_v20 }
 0x638   :  { %2043 = vmatprep.subr.bf16.mxu0 %v2042_v1 }
 0x639   :  { %v1175_v25 = vpop.permute.xlu1 %1174  ;;  %2045 = vmatpush3.bf16.msra.mxu0 %v2042_v1  ;;  %v1180_v42 = vpop.permute.xlu0 %1179 }
 0x63a   :  { %v1196_v41 = vadd.f32 %v1175_v25, %v1148_v22  ;;  %v1197_v26 = vadd.f32 %v1180_v42, %v1149_v55 }
 0x63c   :  { %v1204_v27 = vmax.f32 %v1196_v41, 0.0  ;;  %v1205_v29 = vmax.f32 %v1197_v26, 0.0 }
 0x63d   :  { %v1137_v34 = vpop.permute.xlu1 %1136  ;;  %v1142_v35 = vpop.permute.xlu0 %1141 }
 0x63e   :  { %v2046_v36 = vpack.c.bf16 %v1205_v29, %v1204_v27  ;;  %v1150_v14 = vmul.f32 %v1137_v34, %v2648_v59  ;;  %v1151_v37 = vmul.f32 %v2645_v40, %v1142_v35  ;;  %v1210_v59 = vld [vmem:[%s3039_s10 + $0x10] sm:$0xff]  ;;  %v1211_v40 = vld [vmem:[%s3039_s10 + $0x18] sm:$0xff] }
 0x640   :  { %2047 = vmatprep.subr.bf16.mxu0 %v2046_v36 }
 0x641   :  { %v1185_v43 = vpop.permute.xlu1 %1184  ;;  %2049 = vmatpush3.bf16.msra.mxu0 %v2046_v36  ;;  %v1190_v52 = vpop.permute.xlu0 %1189 }
 0x642   :  { %v1198_v24 = vadd.f32 %v1185_v43, %v1150_v14  ;;  %v1199_v45 = vadd.f32 %v1190_v52, %v1151_v37 }
 0x644   :  { %v1206_v48 = vmax.f32 %v1198_v24, 0.0  ;;  %v1207_v31 = vmax.f32 %v1199_v45, 0.0 }
 0x646   :  { %v2050_v63 = vpack.c.bf16 %v1207_v31, %v1206_v48 }
 0x648   :  { %2051 = vmatprep.subr.bf16.mxu0 %v2050_v63 }
 0x649   :  { %2053 = vmatpush3.bf16.msra.mxu0 %v2050_v63 }
 0x64c   :  { %1967 = vmatmul.mubr.msk.f32.vlgmr.msra.gmra.mrb[8].mxu0 %vm429_vm1, %v1209_v53 }
 0x64d   :  { %1969 = vmatprep.mubr.msk.f32.mxu0 %vm429_vm1, %v1210_v59 }
 0x650   :  { %1970 = vmatmul.mubr.msk.f32.gmra.mrb[10].mxu0 %vm429_vm1, %v1211_v40 }
 0x651   :  { %1972 = vmatprep.mubr.msk.f32.mxu0 %vm429_vm1, %v1212_v58 }
 0x654   :  { %1973 = vmatmul.mubr.msk.f32.gmra.mrb[12].mxu0 %vm429_vm1, %v1213_v60 }
 0x655   :  { %1975 = vmatprep.mubr.msk.f32.mxu0 %vm429_vm1, %v1214_v46 }
 0x658   :  { %1976 = vmatmul.mubr.msk.f32.gmra.mrb[14].mxu0 %vm429_vm1, %v1215_v61 }
 0x71f   :  { %v2794_v38 = vpop.f32.mrb[8].mxu0 }
 0x720   :  { %v2796_v62 = vpop.f32.mrb[9].mxu0  ;;  %v1364_v51 = vsel %vm180_vm0, %v2794_v38, 0.0  ;;  %v1386_v28 = vmul.f32 %v2794_v38, %v2794_v38 }
 0x721   :  { %v1385_v0 = vmul.f32 %v2796_v62, %v2796_v62  ;;  %1365 = vadd.xlane.f32.xlu0 %v1364_v51  ;;  %v1361_v39 = vsel %vm180_vm0, %v2796_v62, 0.0 }
 0x722   :  { %1362 = vadd.xlane.f32.xlu1 %v1361_v39  ;;  %v1396_v12 = vsel %vm180_vm0, %v1386_v28, 0.0 }
 0x723   :  { %v1393_v11 = vsel %vm180_vm0, %v1385_v0, 0.0  ;;  %v2807_v2 = vpop.f32.mrb[10].mxu0 }
 0x724   :  { %v2809_v57 = vpop.f32.mrb[11].mxu0  ;;  %v1370_v5 = vsel %vm180_vm0, %v2807_v2, 0.0  ;;  %v1388_v7 = vmul.f32 %v2807_v2, %v2807_v2 }
 0x725   :  { %1394 = vadd.xlane.f32.xlu0 %v1393_v11  ;;  %v1367_v4 = vsel %vm180_vm0, %v2809_v57, 0.0  ;;  %v1387_v3 = vmul.f32 %v2809_v57, %v2809_v57 }
 0x726   :  { %1397 = vadd.xlane.f32.xlu1 %v1396_v12  ;;  %v1402_v8 = vsel %vm180_vm0, %v1388_v7, 0.0 }
 0x727   :  { %v2816_v6 = vpop.f32.mrb[12].mxu0  ;;  %v1399_v17 = vsel %vm180_vm0, %v1387_v3, 0.0  ;;  %v1345_v3 = vld [vmem:[%s3040_s11] sm:$0xff] }
 0x728   :  { %v2820_v54 = vpop.f32.mrb[13].mxu0  ;;  %v1376_v9 = vsel %vm180_vm0, %v2816_v6, 0.0  ;;  %v1390_v13 = vmul.f32 %v2816_v6, %v2816_v6 }
 0x729   :  { %1368 = vadd.xlane.f32.xlu0 %v1367_v4  ;;  %v1373_v10 = vsel %vm180_vm0, %v2820_v54, 0.0  ;;  %v1389_v23 = vmul.f32 %v2820_v54, %v2820_v54 }
 0x72a   :  { %1371 = vadd.xlane.f32.xlu1 %v1370_v5  ;;  %v1408_v15 = vsel %vm180_vm0, %v1390_v13, 0.0 }
 0x72b   :  { %v2824_v49 = vpop.f32.mrb[14].mxu0  ;;  %v1405_v56 = vsel %vm180_vm0, %v1389_v23, 0.0 }
 0x72c   :  { %v2827_v30 = vpop.f32.mrb[15].mxu0  ;;  %v1382_v50 = vsel %vm180_vm0, %v2824_v49, 0.0  ;;  %v1392_v21 = vmul.f32 %v2824_v49, %v2824_v49 }
 0x72d   :  { %1400 = vadd.xlane.f32.xlu0 %v1399_v17  ;;  %v1379_v16 = vsel %vm180_vm0, %v2827_v30, 0.0  ;;  %v1391_v18 = vmul.f32 %v2827_v30, %v2827_v30 }
 0x72e   :  { %1403 = vadd.xlane.f32.xlu1 %v1402_v8  ;;  %v1414_v44 = vsel %vm180_vm0, %v1392_v21, 0.0  ;;  %v1346_v8 = vld [vmem:[%s3040_s11 + $0x8] sm:$0xff] }
 0x72f   :  { %v1411_v33 = vsel %vm180_vm0, %v1391_v18, 0.0 }
 0x731   :  { %1374 = vadd.xlane.f32.xlu0 %v1373_v10 }
 0x732   :  { %1377 = vadd.xlane.f32.xlu1 %v1376_v9 }
 0x735   :  { %1406 = vadd.xlane.f32.xlu0 %v1405_v56 }
 0x736   :  { %1409 = vadd.xlane.f32.xlu1 %v1408_v15 }
 0x739   :  { %1380 = vadd.xlane.f32.xlu0 %v1379_v16 }
 0x73a   :  { %1383 = vadd.xlane.f32.xlu1 %v1382_v50 }
 0x73d   :  { %1412 = vadd.xlane.f32.xlu0 %v1411_v33  ;;  %v1353_v33 = vld [vmem:[%s3041_s12] sm:$0xff] }
 0x73e   :  { %1415 = vadd.xlane.f32.xlu1 %v1414_v44 }
 0x7ae   :  { %v1366_v32 = vpop.xlane.xlu0 %1365 }
 0x7af   :  { %v1363_v47 = vpop.xlane.xlu1 %1362  ;;  %v2850_v19 = vmul.f32 0.125, %v1366_v32 }
 0x7b0   :  { %v1417_v20 = vmul.f32 0.125, %v1363_v47 }
 0x7b1   :  { %v1434_v42 = vmul.f32 %v2850_v19, %v2850_v19 }
 0x7b2   :  { %v1433_v1 = vmul.f32 %v1417_v20, %v1417_v20  ;;  %v1395_v22 = vpop.xlane.xlu0 %1394 }
 0x7b3   :  { %v1425_v55 = vmul.f32 0.125, %v1395_v22  ;;  %v1398_v25 = vpop.xlane.xlu1 %1397 }
 0x7b4   :  { %v1426_v41 = vmul.f32 0.125, %v1398_v25 }
 0x7b5   :  { %v1441_v26 = vsub.f32 %v1425_v55, %v1433_v1  ;;  %v1354_v1 = vld [vmem:[%s3041_s12 + $0x8] sm:$0xff] }
 0x7b6   :  { %v1442_v27 = vsub.f32 %v1426_v41, %v1434_v42  ;;  %v1369_v29 = vpop.xlane.xlu0 %1368 }
 0x7b7   :  { %v1449_v34 = vmax.f32 %v1441_v26, 0.0  ;;  %v2854_v35 = vmul.f32 0.125, %v1369_v29  ;;  %v1372_v36 = vpop.xlane.xlu1 %1371 }
 0x7b8   :  { %v1450_v14 = vmax.f32 %v1442_v27, 0.0  ;;  %v2856_v37 = vmul.f32 0.125, %v1372_v36 }
 0x7b9   :  { %v1457_v43 = vadd.f32 1e-05, %v1449_v34  ;;  %v1435_v45 = vmul.f32 %v2854_v35, %v2854_v35 }
 0x7ba   :  { %v1458_v52 = vadd.f32 1e-05, %v1450_v14  ;;  %v1401_v24 = vpop.xlane.xlu0 %1400  ;;  %v1436_v63 = vmul.f32 %v2856_v37, %v2856_v37 }
 0x7bb   :  { %2132 = vrsqrt.f32 %v1457_v43  ;;  %v1427_v48 = vmul.f32 0.125, %v1401_v24  ;;  %v1404_v31 = vpop.xlane.xlu1 %1403 }
 0x7bc   :  { %2134 = vrsqrt.f32 %v1458_v52  ;;  %v1428_v53 = vmul.f32 0.125, %v1404_v31 }
 0x7bd   :  { %v1443_v59 = vsub.f32 %v1427_v48, %v1435_v45 }
 0x7be   :  { %v1444_v40 = vsub.f32 %v1428_v53, %v1436_v63  ;;  %v1375_v58 = vpop.xlane.xlu0 %1374  ;;  %v1355_v53 = vld [vmem:[%s3041_s12 + $0x10] sm:$0xff] }
 0x7bf   :  { %v1451_v60 = vmax.f32 %v1443_v59, 0.0  ;;  %v2862_v46 = vmul.f32 0.125, %v1375_v58  ;;  %v1378_v61 = vpop.xlane.xlu1 %1377  ;;  %v1356_v58 = vld [vmem:[%s3041_s12 + $0x18] sm:$0xff] }
 0x7c0   :  { %v1452_v51 = vmax.f32 %v1444_v40, 0.0  ;;  %v2864_v28 = vmul.f32 0.125, %v1378_v61 }
 0x7c1   :  { %v1459_v0 = vadd.f32 1e-05, %v1451_v60  ;;  %v1437_v12 = vmul.f32 %v2862_v46, %v2862_v46 }
 0x7c2   :  { %v1460_v39 = vadd.f32 1e-05, %v1452_v51  ;;  %v1407_v11 = vpop.xlane.xlu0 %1406  ;;  %v1438_v7 = vmul.f32 %v2864_v28, %v2864_v28 }
 0x7c3   :  { %2136 = vrsqrt.f32 %v1459_v0  ;;  %v1429_v4 = vmul.f32 0.125, %v1407_v11  ;;  %v1410_v5 = vpop.xlane.xlu1 %1409  ;;  %v1349_v11 = vld [vmem:[%s3040_s11 + $0x20] sm:$0xff] }
 0x7c4   :  { %2138 = vrsqrt.f32 %v1460_v39  ;;  %v1430_v17 = vmul.f32 0.125, %v1410_v5 }
 0x7c5   :  { %v2133_v10 = vpop.eup %2132  ;;  %v1445_v9 = vsub.f32 %v1429_v4, %v1437_v12 }
 0x7c6   :  { %v2135_v23 = vpop.eup %2134  ;;  %v1446_v13 = vsub.f32 %v1430_v17, %v1438_v7  ;;  %v1381_v56 = vpop.xlane.xlu0 %1380  ;;  %v1473_v15 = vmul.f32 %v2133_v10, %v1345_v3  ;;  %v1358_v17 = vld [vmem:[%s3041_s12 + $0x28] sm:$0xff] }
 0x7c7   :  { %v1453_v16 = vmax.f32 %v1445_v9, 0.0  ;;  %v2876_v50 = vmul.f32 0.125, %v1381_v56  ;;  %v1384_v18 = vpop.xlane.xlu1 %1383  ;;  %v1474_v21 = vmul.f32 %v2135_v23, %v1346_v8  ;;  %v1351_v23 = vld [vmem:[%s3040_s11 + $0x30] sm:$0xff] }
 0x7c8   :  { %v1454_v44 = vmax.f32 %v1446_v13, 0.0  ;;  %v2881_v32 = vmul.f32 0.125, %v1384_v18  ;;  %1499 = vperm.xlu0 %2082, %v1473_v15   ;;  %v1481_v47 = vmul.f32 %v1473_v15, %v1417_v20  ;;  %v1347_v20 = vld [vmem:[%s3040_s11 + $0x10] sm:$0xff]  ;;  %v1352_v13 = vld [vmem:[%s3040_s11 + $0x38] sm:$0xff] }
 0x7c9   :  { %v1461_v22 = vadd.f32 1e-05, %v1453_v16  ;;  %1504 = vperm.xlu1 %2083, %v1474_v21   ;;  %v1482_v55 = vmul.f32 %v1474_v21, %v2850_v19  ;;  %v1439_v26 = vmul.f32 %v2876_v50, %v2876_v50  ;;  %v1348_v19 = vld [vmem:[%s3040_s11 + $0x18] sm:$0xff] }
 0x7ca   :  { %v1462_v25 = vadd.f32 1e-05, %v1454_v44  ;;  %v1413_v42 = vpop.xlane.xlu0 %1412  ;;  %v1489_v41 = vsub.f32 %v1353_v33, %v1481_v47  ;;  %v1440_v36 = vmul.f32 %v2881_v32, %v2881_v32  ;;  %v1360_v18 = vld [vmem:[%s3041_s12 + $0x38] sm:$0xff] }
 0x7cb   :  { %2140 = vrsqrt.f32 %v1461_v22  ;;  %v1431_v27 = vmul.f32 0.125, %v1413_v42  ;;  %v1416_v29 = vpop.xlane.xlu1 %1415  ;;  %v1490_v34 = vsub.f32 %v1354_v1, %v1482_v55  ;;  %v1610_v1 = vld [vmem:[%s3042_s14 + $0x8] sm:$0xff]  ;;  %v1609_v22 = vld [vmem:[%s3042_s14] sm:$0xff] }
 0x7cc   :  { %2142 = vrsqrt.f32 %v1462_v25  ;;  %v1432_v14 = vmul.f32 0.125, %v1416_v29  ;;  %v1601_v55 = vld [vmem:[%s3043_s13] sm:$0xff]  ;;  %v1614_v25 = vld [vmem:[%s3042_s14 + $0x28] sm:$0xff] }
 0x7cd   :  { %v2137_v43 = vpop.eup %2136  ;;  %v1447_v52 = vsub.f32 %v1431_v27, %v1439_v26  ;;  %1547 = vperm.xlu1 %2083, %v1489_v41   ;;  %1552 = vperm.xlu0 %2082, %v1490_v34   ;;  %v1613_v42 = vld [vmem:[%s3042_s14 + $0x20] sm:$0xff]  ;;  %v1616_v41 = vld [vmem:[%s3042_s14 + $0x38] sm:$0xff]  ;;  %v1615_v26 = vld [vmem:[%s3042_s14 + $0x30] sm:$0xff] }
 0x7ce   :  { %v2139_v24 = vpop.eup %2138  ;;  %v1448_v45 = vsub.f32 %v1432_v14, %v1440_v36  ;;  %v1475_v48 = vmul.f32 %v2137_v43, %v1347_v20  ;;  %1994 = vmatprep.mubr.msk.f32.mxu1 %vm429_vm1, %v1601_v55 }
 0x7cf   :  { %v1455_v31 = vmax.f32 %v1447_v52, 0.0  ;;  %v1476_v63 = vmul.f32 %v2139_v24, %v1348_v19 }
 0x7d0   :  { %v1456_v59 = vmax.f32 %v1448_v45, 0.0  ;;  %v1483_v40 = vmul.f32 %v1475_v48, %v2854_v35  ;;  %v1350_v35 = vld [vmem:[%s3040_s11 + $0x28] sm:$0xff] }
 0x7d1   :  { %v1463_v60 = vadd.f32 1e-05, %v1455_v31  ;;  %1509 = vperm.xlu1 %2083, %v1475_v48   ;;  %1514 = vperm.xlu0 %2082, %v1476_v63   ;;  %v1484_v61 = vmul.f32 %v1476_v63, %v2856_v37  ;;  %v1357_v37 = vld [vmem:[%s3041_s12 + $0x20] sm:$0xff] }
 0x7d2   :  { %v1464_v51 = vadd.f32 1e-05, %v1456_v59  ;;  %v1491_v0 = vsub.f32 %v1355_v53, %v1483_v40 }
 0x7d3   :  { %2144 = vrsqrt.f32 %v1463_v60  ;;  %v1492_v39 = vsub.f32 %v1356_v58, %v1484_v61 }
 0x7d4   :  { %2146 = vrsqrt.f32 %v1464_v51 }
 0x7d5   :  { %v2141_v12 = vpop.eup %2140  ;;  %1557 = vperm.xlu1 %2083, %v1491_v0   ;;  %1562 = vperm.xlu0 %2082, %v1492_v39  }
 0x7d6   :  { %v2143_v4 = vpop.eup %2142  ;;  %v1477_v5 = vmul.f32 %v2141_v12, %v1349_v11 }
 0x7d7   :  { %v1478_v3 = vmul.f32 %v2143_v4, %v1350_v35 }
 0x7d8   :  { %v1485_v7 = vmul.f32 %v1477_v5, %v2862_v46 }
 0x7d9   :  { %1519 = vperm.xlu1 %2083, %v1477_v5   ;;  %1524 = vperm.xlu0 %2082, %v1478_v3   ;;  %v1486_v8 = vmul.f32 %v1478_v3, %v2864_v28  ;;  %v1359_v28 = vld [vmem:[%s3041_s12 + $0x30] sm:$0xff] }
 0x7da   :  { %v1493_v10 = vsub.f32 %v1357_v37, %v1485_v7 }
 0x7db   :  { %v1494_v9 = vsub.f32 %v1358_v17, %v1486_v8 }
 0x7dd   :  { %v2145_v56 = vpop.eup %2144  ;;  %1567 = vperm.xlu1 %2083, %v1493_v10   ;;  %1572 = vperm.xlu0 %2082, %v1494_v9  }
 0x7de   :  { %v2147_v46 = vpop.eup %2146  ;;  %v1479_v15 = vmul.f32 %v2145_v56, %v1351_v23 }
 0x7df   :  { %v1480_v16 = vmul.f32 %v2147_v46, %v1352_v13  ;;  %v1602_v46 = vld [vmem:[%s3043_s13 + $0x8] sm:$0xff] }
 0x7e0   :  { %v1487_v21 = vmul.f32 %v1479_v15, %v2876_v50  ;;  %v1612_v50 = vld [vmem:[%s3042_s14 + $0x18] sm:$0xff] }
 0x7e1   :  { %1534 = vperm.xlu0 %2082, %v1480_v16   ;;  %1529 = vperm.xlu1 %2083, %v1479_v15   ;;  %v1488_v33 = vmul.f32 %v1480_v16, %v2881_v32  ;;  %v1611_v32 = vld [vmem:[%s3042_s14 + $0x10] sm:$0xff]  ;;  %v1605_v15 = vld [vmem:[%s3043_s13 + $0x20] sm:$0xff]  ;;  %v1606_v16 = vld [vmem:[%s3043_s13 + $0x28] sm:$0xff] }
 0x7e2   :  { %v1495_v44 = vsub.f32 %v1359_v28, %v1487_v21  ;;  %v1607_v28 = vld [vmem:[%s3043_s13 + $0x30] sm:$0xff] }
 0x7e3   :  { %v1496_v47 = vsub.f32 %v1360_v18, %v1488_v33  ;;  %v1608_v18 = vld [vmem:[%s3043_s13 + $0x38] sm:$0xff] }
 0x7e5   :  { %1582 = vperm.xlu0 %2082, %v1496_v47   ;;  %1577 = vperm.xlu1 %2083, %v1495_v44  }
 0x7e9   :  { %1624 = vperm.xlu0 %2082, %v1610_v1   ;;  %1619 = vperm.xlu1 %2083, %v1609_v22  }
 0x7ed   :  { %1634 = vperm.xlu0 %2082, %v1612_v50   ;;  %1629 = vperm.xlu1 %2083, %v1611_v32  }
 0x7f1   :  { %1644 = vperm.xlu0 %2082, %v1614_v25   ;;  %1639 = vperm.xlu1 %2083, %v1613_v42  }
 0x7f5   :  { %1654 = vperm.xlu0 %2082, %v1616_v41   ;;  %1649 = vperm.xlu1 %2083, %v1615_v26  }
 0x847   :  { %v1500_v27 = vpop.permute.xlu0 %1499 }
 0x848   :  { %v1505_v29 = vpop.permute.xlu1 %1504  ;;  %v1537_v34 = vmul.f32 %v1500_v27, %v2796_v62 }
 0x849   :  { %v1538_v20 = vmul.f32 %v2794_v38, %v1505_v29 }
 0x84c   :  { %v1548_v36 = vpop.permute.xlu1 %1547  ;;  %v1553_v14 = vpop.permute.xlu0 %1552 }
 0x84d   :  { %v1585_v19 = vadd.f32 %v1548_v36, %v1537_v34  ;;  %v1586_v43 = vadd.f32 %v1553_v14, %v1538_v20 }
 0x84f   :  { %v1593_v52 = vmax.f32 %v1585_v19, 0.0  ;;  %v1594_v24 = vmax.f32 %v1586_v43, 0.0 }
 0x850   :  { %v1510_v45 = vpop.permute.xlu1 %1509  ;;  %v1515_v48 = vpop.permute.xlu0 %1514 }
 0x851   :  { %v2054_v31 = vpack.c.bf16 %v1594_v24, %v1593_v52  ;;  %v1539_v63 = vmul.f32 %v1510_v45, %v2809_v57  ;;  %v1540_v53 = vmul.f32 %v2807_v2, %v1515_v48 }
 0x853   :  { %2055 = vmatprep.subr.bf16.mxu1 %v2054_v31 }
 0x854   :  { %v1558_v59 = vpop.permute.xlu1 %1557  ;;  %2057 = vmatpush3.bf16.msra.mxu1 %v2054_v31  ;;  %v1563_v40 = vpop.permute.xlu0 %1562 }
 0x855   :  { %v1587_v62 = vadd.f32 %v1558_v59, %v1539_v63  ;;  %v1588_v58 = vadd.f32 %v1563_v40, %v1540_v53 }
 0x857   :  { %v1595_v38 = vmax.f32 %v1587_v62, 0.0  ;;  %v1596_v60 = vmax.f32 %v1588_v58, 0.0 }
 0x858   :  { %v1520_v61 = vpop.permute.xlu1 %1519  ;;  %v1525_v51 = vpop.permute.xlu0 %1524 }
 0x859   :  { %v2058_v0 = vpack.c.bf16 %v1596_v60, %v1595_v38  ;;  %v1541_v39 = vmul.f32 %v1520_v61, %v2820_v54  ;;  %v1542_v11 = vmul.f32 %v2816_v6, %v1525_v51 }
 0x85b   :  { %2059 = vmatprep.subr.bf16.mxu1 %v2058_v0 }
 0x85c   :  { %v1568_v35 = vpop.permute.xlu1 %1567  ;;  %2061 = vmatpush3.bf16.msra.mxu1 %v2058_v0  ;;  %v1573_v57 = vpop.permute.xlu0 %1572 }
 0x85d   :  { %v1589_v2 = vadd.f32 %v1568_v35, %v1541_v39  ;;  %v1590_v12 = vadd.f32 %v1573_v57, %v1542_v11 }
 0x85f   :  { %v1597_v4 = vmax.f32 %v1589_v2, 0.0  ;;  %v1598_v5 = vmax.f32 %v1590_v12, 0.0 }
 0x860   :  { %v1530_v3 = vpop.permute.xlu1 %1529  ;;  %v1535_v37 = vpop.permute.xlu0 %1534 }
 0x861   :  { %v2062_v7 = vpack.c.bf16 %v1598_v5, %v1597_v4  ;;  %v1543_v17 = vmul.f32 %v1530_v3, %v2827_v30  ;;  %v1544_v8 = vmul.f32 %v2824_v49, %v1535_v37  ;;  %v1603_v30 = vld [vmem:[%s3043_s13 + $0x10] sm:$0xff]  ;;  %v1604_v49 = vld [vmem:[%s3043_s13 + $0x18] sm:$0xff] }
 0x863   :  { %2063 = vmatprep.subr.bf16.mxu1 %v2062_v7 }
 0x864   :  { %v1578_v10 = vpop.permute.xlu1 %1577  ;;  %2065 = vmatpush3.bf16.msra.mxu1 %v2062_v7  ;;  %v1583_v54 = vpop.permute.xlu0 %1582 }
 0x865   :  { %v1591_v6 = vadd.f32 %v1578_v10, %v1543_v17  ;;  %v1592_v9 = vadd.f32 %v1583_v54, %v1544_v8 }
 0x867   :  { %v1599_v23 = vmax.f32 %v1591_v6, 0.0  ;;  %v1600_v13 = vmax.f32 %v1592_v9, 0.0 }
 0x868   :  { %v1625_v21 = vpop.permute.xlu0 %1624  ;;  %v1620_v33 = vpop.permute.xlu1 %1619 }
 0x869   :  { %v2066_v56 = vpack.c.bf16 %v1600_v13, %v1599_v23 }
 0x86b   :  { %2067 = vmatprep.subr.bf16.mxu1 %v2066_v56 }
 0x86c   :  { %2069 = vmatpush3.bf16.msra.mxu1 %v2066_v56  ;;  %v1635_v44 = vpop.permute.xlu0 %1634  ;;  %v1630_v1 = vpop.permute.xlu1 %1629 }
 0x86f   :  { %1995 = vmatmul.mubr.msk.f32.vlgmr.msra.gmra.mrb[8].mxu1 %vm429_vm1, %v1602_v46 }
 0x870   :  { %1997 = vmatprep.mubr.msk.f32.mxu1 %vm429_vm1, %v1603_v30  ;;  %v1645_v41 = vpop.permute.xlu0 %1644  ;;  %v1640_v27 = vpop.permute.xlu1 %1639 }
 0x873   :  { %1998 = vmatmul.mubr.msk.f32.gmra.mrb[10].mxu1 %vm429_vm1, %v1604_v49 }
 0x874   :  { %2000 = vmatprep.mubr.msk.f32.mxu1 %vm429_vm1, %v1605_v15  ;;  %v1655_v14 = vpop.permute.xlu0 %1654  ;;  %v1650_v43 = vpop.permute.xlu1 %1649 }
 0x877   :  { %2001 = vmatmul.mubr.msk.f32.gmra.mrb[12].mxu1 %vm429_vm1, %v1606_v16 }
 0x878   :  { %2003 = vmatprep.mubr.msk.f32.mxu1 %vm429_vm1, %v1607_v28 }
 0x87b   :  { %2004 = vmatmul.mubr.msk.f32.gmra.mrb[14].mxu1 %vm429_vm1, %v1608_v18 }
 0x942   :  { %v1996_v47 = vpop.f32.mrb[8].mxu1 }
 0x943   :  { %v1753_v22 = vadd.f32 %v1996_v47, %v1625_v21  ;;  %v1747_v50 = vpop.f32.mrb[9].mxu1 }
 0x944   :  { %v1748_v32 = vadd.f32 %v1747_v50, %v1620_v33 }
 0x945   :  { %1787 = vst.msk [vmem:[%s3044_s15 + $0x8] sm:$0xff] %vm180_vm0, %v1753_v22 }
 0x946   :  { %1786 = vst.msk [vmem:[%s3044_s15] sm:$0xff] %vm180_vm0, %v1748_v32  ;;  %v1999_v55 = vpop.f32.mrb[10].mxu1 }
 0x947   :  { %v1763_v25 = vadd.f32 %v1999_v55, %v1635_v44  ;;  %v1757_v42 = vpop.f32.mrb[11].mxu1 }
 0x948   :  { %v1758_v26 = vadd.f32 %v1757_v42, %v1630_v1 }
 0x949   :  { %1789 = vst.msk [vmem:[%s3044_s15 + $0x18] sm:$0xff] %vm180_vm0, %v1763_v25 }
 0x94a   :  { %1788 = vst.msk [vmem:[%s3044_s15 + $0x10] sm:$0xff] %vm180_vm0, %v1758_v26  ;;  %v2002_v29 = vpop.f32.mrb[12].mxu1 }
 0x94b   :  { %v1773_v34 = vadd.f32 %v2002_v29, %v1645_v41  ;;  %v1767_v20 = vpop.f32.mrb[13].mxu1 }
 0x94c   :  { %v1768_v36 = vadd.f32 %v1767_v20, %v1640_v27 }
 0x94d   :  { %1791 = vst.msk [vmem:[%s3044_s15 + $0x28] sm:$0xff] %vm180_vm0, %v1773_v34 }
 0x94e   :  { %1790 = vst.msk [vmem:[%s3044_s15 + $0x20] sm:$0xff] %vm180_vm0, %v1768_v36  ;;  %v2005_v19 = vpop.f32.mrb[14].mxu1 }
 0x94f   :  { %v1783_v52 = vadd.f32 %v2005_v19, %v1655_v14  ;;  %v1777_v24 = vpop.f32.mrb[15].mxu1 }
 0x950   :  { %v1778_v45 = vadd.f32 %v1777_v24, %v1650_v43 }
 0x951   :  { %1793 = vst.msk [vmem:[%s3044_s15 + $0x38] sm:$0xff] %vm180_vm0, %v1783_v52 }
 0x952   :  { %1792 = vst.msk [vmem:[%s3044_s15 + $0x30] sm:$0xff] %vm180_vm0, %v1778_v45 }

</bundles_post_ra>
